<compile_context>
chip_gen: v5e
topology: v5e:2x2
jax: 0.10.0
libtpu: 0.0.40
codegen_flags: <defaults>
</compile_context>

<pallas_src>
import functools

import jax
import jax.numpy as jnp
from jax.experimental import pallas as pl
from jax.experimental.pallas import tpu as pltpu


_VMEM_LIMIT = 48 * 1024 * 1024
_BN_EPS = 1e-5


def _round_up(x, m):
    return (x + m - 1) // m * m


# ---------------------------------------------------------------------------
# Pallas kernels  (lane-dense: out[Cp, M] = W[Cp, Kp] @ P[Kp, M])
# ---------------------------------------------------------------------------
def _conv_act_kernel(w_ref, p_ref, out_ref, *, epilogue):
    """Matmul-conv, f32 accumulate, fused pointwise activation."""
    acc = jnp.dot(w_ref[...], p_ref[...], preferred_element_type=jnp.float32)
    if epilogue == "leaky":
        acc = jnp.maximum(acc, 0.2 * acc)            # LeakyReLU(0.2)
    elif epilogue == "sigmoid":
        acc = 1.0 / (1.0 + jnp.exp(-acc))            # Sigmoid (EUP exp)
    out_ref[...] = acc.astype(out_ref.dtype)


def _conv_bn_leaky_kernel(w_ref, p_ref, g_ref, b_ref, out_ref, *, m_valid):
    """Conv + training-mode BatchNorm (batch stats, biased var) + LeakyReLU(0.2),
    fully fused.  Requires the whole batch's output columns (M) in this single
    tile because BN statistics are a full-batch reduction."""
    acc = jnp.dot(w_ref[...], p_ref[...], preferred_element_type=jnp.float32)
    col = jax.lax.broadcasted_iota(jnp.int32, acc.shape, 1)
    mask = (col < m_valid).astype(jnp.float32)       # ignore zero-padded columns
    inv_m = 1.0 / m_valid
    mean = jnp.sum(acc * mask, axis=1, keepdims=True) * inv_m
    diff = (acc - mean) * mask
    var = jnp.sum(diff * diff, axis=1, keepdims=True) * inv_m
    scale = g_ref[...] * jax.lax.rsqrt(var + _BN_EPS)   # EUP rsqrt
    y = diff * scale + b_ref[...]
    y = jnp.maximum(y, 0.2 * y)                      # LeakyReLU(0.2)
    out_ref[...] = y.astype(out_ref.dtype)


def _conv_stats_kernel(w_ref, p_ref, out_ref, sum_ref, sq_ref):
    """Fallback (M too big for one tile): raw conv output + per-channel partial
    sum / sum-of-squares so BN stats never need a second pass over HBM."""
    acc = jnp.dot(w_ref[...], p_ref[...], preferred_element_type=jnp.float32)
    sum_ref[0, :, :] = jnp.sum(acc, axis=1, keepdims=True)
    sq_ref[0, :, :] = jnp.sum(acc * acc, axis=1, keepdims=True)
    out_ref[...] = acc.astype(out_ref.dtype)


# ---------------------------------------------------------------------------
# pallas_call wrappers (padding / tiling decisions)
# ---------------------------------------------------------------------------
def _pad_w(w_mat, c_pad, k_pad):
    c_out, k = w_mat.shape
    return jnp.zeros((c_pad, k_pad), jnp.bfloat16).at[:c_out, :k].set(
        w_mat.astype(jnp.bfloat16))


def _pad_p(patches, k_pad, m_pad):
    k, m = patches.shape
    return jnp.zeros((k_pad, m_pad), jnp.bfloat16).at[:k, :m].set(
        patches.astype(jnp.bfloat16))


def _conv_matmul(w_mat, patches, *, epilogue, out_dtype):
    """Conv as a matmul tiled over M; weights VMEM-resident, no K grid axis."""
    c_out, k = w_mat.shape
    _, m = patches.shape
    c_pad = _round_up(c_out, 8)
    k_pad = _round_up(k, 128)
    m_tile = min(1024, _round_up(m, 128))
    m_pad = _round_up(m, m_tile)

    w_p = _pad_w(w_mat, c_pad, k_pad)
    p_p = _pad_p(patches, k_pad, m_pad)

    return pl.pallas_call(
        functools.partial(_conv_act_kernel, epilogue=epilogue),
        grid=(m_pad // m_tile,),
        in_specs=[pl.BlockSpec((c_pad, k_pad), lambda i: (0, 0)),
                  pl.BlockSpec((k_pad, m_tile), lambda i: (0, i))],
        out_specs=pl.BlockSpec((c_pad, m_tile), lambda i: (0, i)),
        out_shape=jax.ShapeDtypeStruct((c_pad, m_pad), out_dtype),
        compiler_params=pltpu.CompilerParams(
            dimension_semantics=("parallel",),       # v7x: shard M across TCs
            vmem_limit_bytes=_VMEM_LIMIT),
    )(w_p, p_p)


def _conv_bn_matmul_fused(w_mat, patches, gamma, beta):
    """Single-tile fused Conv+BN+LeakyReLU (whole batch in one M tile)."""
    c_out, k = w_mat.shape
    _, m = patches.shape
    c_pad = _round_up(c_out, 8)
    k_pad = _round_up(k, 128)
    m_pad = _round_up(m, 128)

    w_p = _pad_w(w_mat, c_pad, k_pad)
    p_p = _pad_p(patches, k_pad, m_pad)
    g_p = jnp.zeros((c_pad, 1), jnp.float32).at[:c_out, 0].set(
        gamma.astype(jnp.float32))
    b_p = jnp.zeros((c_pad, 1), jnp.float32).at[:c_out, 0].set(
        beta.astype(jnp.float32))

    return pl.pallas_call(
        functools.partial(_conv_bn_leaky_kernel, m_valid=m),
        grid=(1,),
        in_specs=[pl.BlockSpec((c_pad, k_pad), lambda i: (0, 0)),
                  pl.BlockSpec((k_pad, m_pad), lambda i: (0, 0)),
                  pl.BlockSpec((c_pad, 1), lambda i: (0, 0)),
                  pl.BlockSpec((c_pad, 1), lambda i: (0, 0))],
        out_specs=pl.BlockSpec((c_pad, m_pad), lambda i: (0, 0)),
        out_shape=jax.ShapeDtypeStruct((c_pad, m_pad), jnp.bfloat16),
        compiler_params=pltpu.CompilerParams(
            dimension_semantics=("arbitrary",),
            vmem_limit_bytes=_VMEM_LIMIT),
    )(w_p, p_p, g_p, b_p)


def _conv_bn_matmul_tiled(w_mat, patches, gamma, beta):
    """Fallback for large M: in-kernel partial BN stats, fold in the wrapper."""
    c_out, k = w_mat.shape
    _, m = patches.shape
    c_pad = _round_up(c_out, 8)
    k_pad = _round_up(k, 128)
    m_tile = min(2048, _round_up(m, 128))
    m_pad = _round_up(m, m_tile)
    n_tiles = m_pad // m_tile

    w_p = _pad_w(w_mat, c_pad, k_pad)
    p_p = _pad_p(patches, k_pad, m_pad)

    out, sums, sqs = pl.pallas_call(
        _conv_stats_kernel,
        grid=(n_tiles,),
        in_specs=[pl.BlockSpec((c_pad, k_pad), lambda i: (0, 0)),
                  pl.BlockSpec((k_pad, m_tile), lambda i: (0, i))],
        out_specs=(pl.BlockSpec((c_pad, m_tile), lambda i: (0, i)),
                   pl.BlockSpec((1, c_pad, 1), lambda i: (i, 0, 0)),
                   pl.BlockSpec((1, c_pad, 1), lambda i: (i, 0, 0))),
        out_shape=(jax.ShapeDtypeStruct((c_pad, m_pad), jnp.bfloat16),
                   jax.ShapeDtypeStruct((n_tiles, c_pad, 1), jnp.float32),
                   jax.ShapeDtypeStruct((n_tiles, c_pad, 1), jnp.float32)),
        compiler_params=pltpu.CompilerParams(
            dimension_semantics=("parallel",),
            vmem_limit_bytes=_VMEM_LIMIT),
    )(w_p, p_p)

    s = jnp.sum(sums, axis=0)[:c_out, 0]
    sq = jnp.sum(sqs, axis=0)[:c_out, 0]
    mean = s / m
    var = jnp.maximum(sq / m - mean * mean, 0.0)     # biased variance
    scale = gamma.astype(jnp.float32) / jnp.sqrt(var + _BN_EPS)
    bias = beta.astype(jnp.float32) - mean * scale
    a = out[:c_out].astype(jnp.float32) * scale[:, None] + bias[:, None]
    a = jnp.maximum(a, 0.2 * a)
    return a.astype(jnp.bfloat16)


# ---------------------------------------------------------------------------
# Host-side glue: im2col (bf16) and layout conversion
# ---------------------------------------------------------------------------
def _im2col(x_nhwc, kh, kw, stride, pad):
    """Patch matrix (C_in*kh*kw, N*Ho*Wo); row order (ci, i, j) matching
    torch weight.reshape(C_out, -1).  Plain-JAX glue, emitted in bf16."""
    if pad:
        x_nhwc = jnp.pad(x_nhwc, ((0, 0), (pad, pad), (pad, pad), (0, 0)))
    n, hp, wp, c = x_nhwc.shape
    ho = (hp - kh) // stride + 1
    wo = (wp - kw) // stride + 1
    cols = []
    for i in range(kh):
        for j in range(kw):
            win = jax.lax.slice(
                x_nhwc,
                (0, i, j, 0),
                (n, i + (ho - 1) * stride + 1, j + (wo - 1) * stride + 1, c),
                (1, stride, stride, 1),
            )
            cols.append(win)                          # (N, Ho, Wo, C)
    p = jnp.stack(cols, axis=0).reshape(kh, kw, n, ho, wo, c)
    p = p.transpose(5, 0, 1, 2, 3, 4).reshape(c * kh * kw, n * ho * wo)
    return p, ho, wo


def _colmat_to_nhwc(colmat, c, n, ho, wo):
    a = colmat[:c, : n * ho * wo]
    return a.reshape(c, n, ho, wo).transpose(1, 2, 3, 0)


def _conv_block(x_nhwc, w, stride, pad, *, kind, gamma=None, beta=None,
                out_dtype=jnp.bfloat16):
    """One Conv(+BN)(+activation) block; input/output are NHWC activations."""
    c_out, c_in, kh, kw = w.shape
    n = x_nhwc.shape[0]
    patches, ho, wo = _im2col(x_nhwc.astype(jnp.bfloat16), kh, kw, stride, pad)
    w_mat = w.reshape(c_out, c_in * kh * kw)
    m = n * ho * wo

    if kind == "bn_leaky":
        c_pad = _round_up(c_out, 8)
        k_pad = _round_up(c_in * kh * kw, 128)
        m_pad = _round_up(m, 128)
        # Rough per-call VMEM footprint of the fused single-tile path
        # (double-buffered bf16 operands + f32 working set).
        fused_bytes = (4 * (c_pad * k_pad + k_pad * m_pad + c_pad * m_pad)
                       + 24 * c_pad * m_pad)
        if fused_bytes <= 24 * 1024 * 1024:
            colmat = _conv_bn_matmul_fused(w_mat, patches, gamma, beta)
        else:
            colmat = _conv_bn_matmul_tiled(w_mat, patches, gamma, beta)
    else:
        colmat = _conv_matmul(w_mat, patches, epilogue=kind, out_dtype=out_dtype)

    return _colmat_to_nhwc(colmat, c_out, n, ho, wo)


# ---------------------------------------------------------------------------
# NetD forward
# ---------------------------------------------------------------------------
def netd_forward(x_nchw, params):
    x = jnp.transpose(x_nchw, (0, 2, 3, 1))          # NCHW -> NHWC

    # L1: Conv(3->ndf, 5, s3, p1) + LeakyReLU (kernel epilogue).
    a1 = _conv_block(x, params["w1"], 3, 1, kind="leaky")
    # L2-L4: Conv + training-mode BatchNorm + LeakyReLU, all fused in-kernel.
    a2 = _conv_block(a1, params["w2"], 2, 1, kind="bn_leaky",
                     gamma=params["g2"], beta=params["b2"])
    a3 = _conv_block(a2, params["w3"], 2, 1, kind="bn_leaky",
                     gamma=params["g3"], beta=params["b3"])
    a4 = _conv_block(a3, params["w4"], 2, 1, kind="bn_leaky",
                     gamma=params["g4"], beta=params["b4"])
    # L5: Conv(8ndf->1, 4, s1, p0) + Sigmoid (kernel epilogue) -> .view(-1)
    a5 = _conv_block(a4, params["w5"], 1, 0, kind="sigmoid",
                     out_dtype=jnp.float32)
    return a5.reshape(-1)


# ---------------------------------------------------------------------------
# Demo
# ---------------------------------------------------------------------------
if __name__ == "__main__":
    key = jax.random.PRNGKey(0)
    ndf = 8
    batch = 2
    ks = jax.random.split(key, 6)
    params = {
        "w1": 0.02 * jax.random.normal(ks[0], (ndf, 3, 5, 5), jnp.float32),
        "w2": 0.02 * jax.random.normal(ks[1], (2 * ndf, ndf, 4, 4), jnp.float32),
        "w3": 0.02 * jax.random.normal(ks[2], (4 * ndf, 2 * ndf, 4, 4), jnp.float32),
        "w4": 0.02 * jax.random.normal(ks[3], (8 * ndf, 4 * ndf, 4, 4), jnp.float32),
        "w5": 0.02 * jax.random.normal(ks[4], (1, 8 * ndf, 4, 4), jnp.float32),
        # Fresh BatchNorm2d parameters (gamma=1, beta=0), training-mode stats.
        "g2": jnp.ones((2 * ndf,), jnp.float32), "b2": jnp.zeros((2 * ndf,), jnp.float32),
        "g3": jnp.ones((4 * ndf,), jnp.float32), "b3": jnp.zeros((4 * ndf,), jnp.float32),
        "g4": jnp.ones((8 * ndf,), jnp.float32), "b4": jnp.zeros((8 * ndf,), jnp.float32),
    }
    # 96x96 input is what the conv chain (5/3/1 -> 4/2/1 x3 -> 4/1/0) requires.
    x = jax.random.normal(ks[5], (batch, 3, 96, 96), jnp.float32)

    out = jax.jit(netd_forward)(x, params)
    out = jax.block_until_ready(out)
    assert out.shape == (batch,)
    assert bool(jnp.all(jnp.isfinite(out)))
    assert bool(jnp.all((out >= 0) & (out <= 1)))
    print("KERNEL_OK")
</pallas_src>

<mosaic_0001>
module attributes {stable_mosaic.version = 11 : i64} {
  func.func @_conv_act_kernel(%arg0: i32, %arg1: memref<8x128xbf16, #tpu.memory_space<vmem>>, %arg2: memref<128x1024xbf16, #tpu.memory_space<vmem>>, %arg3: memref<8x1024xbf16, #tpu.memory_space<vmem>>) attributes {dimension_semantics = [#tpu.dimension_semantics<parallel>], iteration_bounds = array<i64: 2>, scalar_prefetch = 0 : i64, scratch_operands = 0 : i64, tpu.core_type = #tpu.core_type<tc>, window_params = [{pipeline_mode = #tpu.pipeline_mode<synchronous>, transform_indices = @transform_0, window_bounds = array<i64: 8, 128>}, {transform_indices = @transform_1, window_bounds = array<i64: 128, 1024>}, {transform_indices = @transform_2, window_bounds = array<i64: 8, 1024>}]} {
    %c0 = arith.constant 0 : index
    %c0_0 = arith.constant 0 : index
    %0 = vector.load %arg1[%c0, %c0_0] : memref<8x128xbf16, #tpu.memory_space<vmem>>, vector<8x128xbf16>
    %c0_1 = arith.constant 0 : index
    %c0_2 = arith.constant 0 : index
    %1 = vector.load %arg2[%c0_1, %c0_2] : memref<128x1024xbf16, #tpu.memory_space<vmem>>, vector<128x1024xbf16>
    %cst = arith.constant dense<0.000000e+00> : vector<8x1024xf32>
    %2 = tpu.matmul %0, %1, %cst {dimension_numbers = #tpu.dot_dimension_numbers<[1], [0], [0], [1], [0, 0, 1, 1], [], []>} : vector<8x128xbf16>, vector<128x1024xbf16>, vector<8x1024xf32> -> vector<8x1024xf32>
    %cst_3 = arith.constant 2.000000e-01 : f32
    %3 = vector.broadcast %cst_3 : f32 to vector<8x1024xf32>
    %4 = arith.mulf %3, %2 : vector<8x1024xf32>
    %5 = arith.maximumf %2, %4 : vector<8x1024xf32>
    %6 = arith.truncf %5 : vector<8x1024xf32> to vector<8x1024xbf16>
    %c0_4 = arith.constant 0 : index
    %c0_5 = arith.constant 0 : index
    %7 = vector.load %arg3[%c0_4, %c0_5] : memref<8x1024xbf16, #tpu.memory_space<vmem>>, vector<8x1024xbf16>
    tpu.vector_store %arg3[%c0_4, %c0_5], %6 {strides = array<i32>} : memref<8x1024xbf16, #tpu.memory_space<vmem>>, vector<8x1024xbf16>,
    return
  }
  func.func @transform_0(%arg0: i32) -> (i32, i32) {
    %c0_i32 = arith.constant 0 : i32
    %c0_i32_0 = arith.constant 0 : i32
    %c0_i32_1 = arith.constant 0 : i32
    return %c0_i32, %c0_i32_0 : i32, i32
  }
  func.func @transform_1(%arg0: i32) -> (i32, i32) {
    %c0_i32 = arith.constant 0 : i32
    %c0_i32_0 = arith.constant 0 : i32
    return %c0_i32, %arg0 : i32, i32
  }
  func.func @transform_2(%arg0: i32) -> (i32, i32) {
    %c0_i32 = arith.constant 0 : i32
    %c0_i32_0 = arith.constant 0 : i32
    return %c0_i32, %arg0 : i32, i32
  }
}

module attributes {stable_mosaic.version = 11 : i64} {
  func.func @_conv_bn_leaky_kernel(%arg0: i32, %arg1: memref<16x128xbf16, #tpu.memory_space<vmem>>, %arg2: memref<128x512xbf16, #tpu.memory_space<vmem>>, %arg3: memref<16x1xf32, #tpu.memory_space<vmem>>, %arg4: memref<16x1xf32, #tpu.memory_space<vmem>>, %arg5: memref<16x512xbf16, #tpu.memory_space<vmem>>) attributes {dimension_semantics = [#tpu.dimension_semantics<arbitrary>], iteration_bounds = array<i64: 1>, scalar_prefetch = 0 : i64, scratch_operands = 0 : i64, tpu.core_type = #tpu.core_type<tc>, window_params = [{pipeline_mode = #tpu.pipeline_mode<synchronous>, transform_indices = @transform_0, window_bounds = array<i64: 16, 128>}, {pipeline_mode = #tpu.pipeline_mode<synchronous>, transform_indices = @transform_1, window_bounds = array<i64: 128, 512>}, {pipeline_mode = #tpu.pipeline_mode<synchronous>, transform_indices = @transform_2, window_bounds = array<i64: 16, 1>}, {pipeline_mode = #tpu.pipeline_mode<synchronous>, transform_indices = @transform_3, window_bounds = array<i64: 16, 1>}, {pipeline_mode = #tpu.pipeline_mode<synchronous>, transform_indices = @transform_4, window_bounds = array<i64: 16, 512>}]} {
    %c0 = arith.constant 0 : index
    %c0_0 = arith.constant 0 : index
    %0 = vector.load %arg1[%c0, %c0_0] : memref<16x128xbf16, #tpu.memory_space<vmem>>, vector<16x128xbf16>
    %c0_1 = arith.constant 0 : index
    %c0_2 = arith.constant 0 : index
    %1 = vector.load %arg2[%c0_1, %c0_2] : memref<128x512xbf16, #tpu.memory_space<vmem>>, vector<128x512xbf16>
    %cst = arith.constant dense<0.000000e+00> : vector<16x512xf32>
    %2 = tpu.matmul %0, %1, %cst {dimension_numbers = #tpu.dot_dimension_numbers<[1], [0], [0], [1], [0, 0, 1, 1], [], []>} : vector<16x128xbf16>, vector<128x512xbf16>, vector<16x512xf32> -> vector<16x512xf32>
    %3 = tpu.iota {dimensions = array<i32: 1>} : vector<16x512xi32>
    %c512_i32 = arith.constant 512 : i32
    %4 = vector.broadcast %c512_i32 : i32 to vector<16x512xi32>
    %5 = arith.cmpi slt, %3, %4 : vector<16x512xi32>
    %6 = arith.extui %5 : vector<16x512xi1> to vector<16x512xi32>
    %7 = arith.sitofp %6 : vector<16x512xi32> to vector<16x512xf32>
    %8 = arith.mulf %2, %7 : vector<16x512xf32>
    %cst_3 = arith.constant dense<0.000000e+00> : vector<16xf32>
    %9 = vector.multi_reduction <add>, %8, %cst_3 [1] : vector<16x512xf32> to vector<16xf32>
    %10 = vector.shape_cast %9 : vector<16xf32> to vector<16x1xf32>
    %cst_4 = arith.constant 0.001953125 : f32
    %11 = vector.broadcast %cst_4 : f32 to vector<16x1xf32>
    %12 = arith.mulf %10, %11 : vector<16x1xf32>
    %13 = vector.broadcast %12 : vector<16x1xf32> to vector<16x512xf32>
    %14 = arith.subf %2, %13 : vector<16x512xf32>
    %15 = arith.mulf %14, %7 : vector<16x512xf32>
    %16 = arith.mulf %15, %15 : vector<16x512xf32>
    %cst_5 = arith.constant dense<0.000000e+00> : vector<16xf32>
    %17 = vector.multi_reduction <add>, %16, %cst_5 [1] : vector<16x512xf32> to vector<16xf32>
    %18 = vector.shape_cast %17 : vector<16xf32> to vector<16x1xf32>
    %cst_6 = arith.constant 0.001953125 : f32
    %19 = vector.broadcast %cst_6 : f32 to vector<16x1xf32>
    %20 = arith.mulf %18, %19 : vector<16x1xf32>
    %c0_7 = arith.constant 0 : index
    %c0_8 = arith.constant 0 : index
    %21 = vector.load %arg3[%c0_7, %c0_8] : memref<16x1xf32, #tpu.memory_space<vmem>>, vector<16x1xf32>
    %cst_9 = arith.constant 9.99999974E-6 : f32
    %22 = vector.broadcast %cst_9 : f32 to vector<16x1xf32>
    %23 = arith.addf %20, %22 : vector<16x1xf32>
    %24 = math.rsqrt %23 : vector<16x1xf32>
    %25 = arith.mulf %21, %24 : vector<16x1xf32>
    %26 = vector.broadcast %25 : vector<16x1xf32> to vector<16x512xf32>
    %27 = arith.mulf %15, %26 : vector<16x512xf32>
    %c0_10 = arith.constant 0 : index
    %c0_11 = arith.constant 0 : index
    %28 = vector.load %arg4[%c0_10, %c0_11] : memref<16x1xf32, #tpu.memory_space<vmem>>, vector<16x1xf32>
    %29 = vector.broadcast %28 : vector<16x1xf32> to vector<16x512xf32>
    %30 = arith.addf %27, %29 : vector<16x512xf32>
    %cst_12 = arith.constant 2.000000e-01 : f32
    %31 = vector.broadcast %cst_12 : f32 to vector<16x512xf32>
    %32 = arith.mulf %31, %30 : vector<16x512xf32>
    %33 = arith.maximumf %30, %32 : vector<16x512xf32>
    %34 = arith.truncf %33 : vector<16x512xf32> to vector<16x512xbf16>
    %c0_13 = arith.constant 0 : index
    %c0_14 = arith.constant 0 : index
    %35 = vector.load %arg5[%c0_13, %c0_14] : memref<16x512xbf16, #tpu.memory_space<vmem>>, vector<16x512xbf16>
    tpu.vector_store %arg5[%c0_13, %c0_14], %34 {strides = array<i32>} : memref<16x512xbf16, #tpu.memory_space<vmem>>, vector<16x512xbf16>,
    return
  }
  func.func @transform_0(%arg0: i32) -> (i32, i32) {
    %c0_i32 = arith.constant 0 : i32
    %c0_i32_0 = arith.constant 0 : i32
    %c0_i32_1 = arith.constant 0 : i32
    return %c0_i32, %c0_i32_0 : i32, i32
  }
  func.func @transform_1(%arg0: i32) -> (i32, i32) {
    %c0_i32 = arith.constant 0 : i32
    %c0_i32_0 = arith.constant 0 : i32
    %c0_i32_1 = arith.constant 0 : i32
    return %c0_i32, %c0_i32_0 : i32, i32
  }
  func.func @transform_2(%arg0: i32) -> (i32, i32) {
    %c0_i32 = arith.constant 0 : i32
    %c0_i32_0 = arith.constant 0 : i32
    %c0_i32_1 = arith.constant 0 : i32
    return %c0_i32, %c0_i32_0 : i32, i32
  }
  func.func @transform_3(%arg0: i32) -> (i32, i32) {
    %c0_i32 = arith.constant 0 : i32
    %c0_i32_0 = arith.constant 0 : i32
    %c0_i32_1 = arith.constant 0 : i32
    return %c0_i32, %c0_i32_0 : i32, i32
  }
  func.func @transform_4(%arg0: i32) -> (i32, i32) {
    %c0_i32 = arith.constant 0 : i32
    %c0_i32_0 = arith.constant 0 : i32
    %c0_i32_1 = arith.constant 0 : i32
    return %c0_i32, %c0_i32_0 : i32, i32
  }
}

module attributes {stable_mosaic.version = 11 : i64} {
  func.func @_conv_bn_leaky_kernel(%arg0: i32, %arg1: memref<32x256xbf16, #tpu.memory_space<vmem>>, %arg2: memref<256x128xbf16, #tpu.memory_space<vmem>>, %arg3: memref<32x1xf32, #tpu.memory_space<vmem>>, %arg4: memref<32x1xf32, #tpu.memory_space<vmem>>, %arg5: memref<32x128xbf16, #tpu.memory_space<vmem>>) attributes {dimension_semantics = [#tpu.dimension_semantics<arbitrary>], iteration_bounds = array<i64: 1>, scalar_prefetch = 0 : i64, scratch_operands = 0 : i64, tpu.core_type = #tpu.core_type<tc>, window_params = [{pipeline_mode = #tpu.pipeline_mode<synchronous>, transform_indices = @transform_0, window_bounds = array<i64: 32, 256>}, {pipeline_mode = #tpu.pipeline_mode<synchronous>, transform_indices = @transform_1, window_bounds = array<i64: 256, 128>}, {pipeline_mode = #tpu.pipeline_mode<synchronous>, transform_indices = @transform_2, window_bounds = array<i64: 32, 1>}, {pipeline_mode = #tpu.pipeline_mode<synchronous>, transform_indices = @transform_3, window_bounds = array<i64: 32, 1>}, {pipeline_mode = #tpu.pipeline_mode<synchronous>, transform_indices = @transform_4, window_bounds = array<i64: 32, 128>}]} {
    %c0 = arith.constant 0 : index
    %c0_0 = arith.constant 0 : index
    %0 = vector.load %arg1[%c0, %c0_0] : memref<32x256xbf16, #tpu.memory_space<vmem>>, vector<32x256xbf16>
    %c0_1 = arith.constant 0 : index
    %c0_2 = arith.constant 0 : index
    %1 = vector.load %arg2[%c0_1, %c0_2] : memref<256x128xbf16, #tpu.memory_space<vmem>>, vector<256x128xbf16>
    %cst = arith.constant dense<0.000000e+00> : vector<32x128xf32>
    %2 = tpu.matmul %0, %1, %cst {dimension_numbers = #tpu.dot_dimension_numbers<[1], [0], [0], [1], [0, 0, 1, 1], [], []>} : vector<32x256xbf16>, vector<256x128xbf16>, vector<32x128xf32> -> vector<32x128xf32>
    %3 = tpu.iota {dimensions = array<i32: 1>} : vector<32x128xi32>
    %c128_i32 = arith.constant 128 : i32
    %4 = vector.broadcast %c128_i32 : i32 to vector<32x128xi32>
    %5 = arith.cmpi slt, %3, %4 : vector<32x128xi32>
    %6 = arith.extui %5 : vector<32x128xi1> to vector<32x128xi32>
    %7 = arith.sitofp %6 : vector<32x128xi32> to vector<32x128xf32>
    %8 = arith.mulf %2, %7 : vector<32x128xf32>
    %cst_3 = arith.constant dense<0.000000e+00> : vector<32xf32>
    %9 = vector.multi_reduction <add>, %8, %cst_3 [1] : vector<32x128xf32> to vector<32xf32>
    %10 = vector.shape_cast %9 : vector<32xf32> to vector<32x1xf32>
    %cst_4 = arith.constant 7.812500e-03 : f32
    %11 = vector.broadcast %cst_4 : f32 to vector<32x1xf32>
    %12 = arith.mulf %10, %11 : vector<32x1xf32>
    %13 = vector.broadcast %12 : vector<32x1xf32> to vector<32x128xf32>
    %14 = arith.subf %2, %13 : vector<32x128xf32>
    %15 = arith.mulf %14, %7 : vector<32x128xf32>
    %16 = arith.mulf %15, %15 : vector<32x128xf32>
    %cst_5 = arith.constant dense<0.000000e+00> : vector<32xf32>
    %17 = vector.multi_reduction <add>, %16, %cst_5 [1] : vector<32x128xf32> to vector<32xf32>
    %18 = vector.shape_cast %17 : vector<32xf32> to vector<32x1xf32>
    %cst_6 = arith.constant 7.812500e-03 : f32
    %19 = vector.broadcast %cst_6 : f32 to vector<32x1xf32>
    %20 = arith.mulf %18, %19 : vector<32x1xf32>
    %c0_7 = arith.constant 0 : index
    %c0_8 = arith.constant 0 : index
    %21 = vector.load %arg3[%c0_7, %c0_8] : memref<32x1xf32, #tpu.memory_space<vmem>>, vector<32x1xf32>
    %cst_9 = arith.constant 9.99999974E-6 : f32
    %22 = vector.broadcast %cst_9 : f32 to vector<32x1xf32>
    %23 = arith.addf %20, %22 : vector<32x1xf32>
    %24 = math.rsqrt %23 : vector<32x1xf32>
    %25 = arith.mulf %21, %24 : vector<32x1xf32>
    %26 = vector.broadcast %25 : vector<32x1xf32> to vector<32x128xf32>
    %27 = arith.mulf %15, %26 : vector<32x128xf32>
    %c0_10 = arith.constant 0 : index
    %c0_11 = arith.constant 0 : index
    %28 = vector.load %arg4[%c0_10, %c0_11] : memref<32x1xf32, #tpu.memory_space<vmem>>, vector<32x1xf32>
    %29 = vector.broadcast %28 : vector<32x1xf32> to vector<32x128xf32>
    %30 = arith.addf %27, %29 : vector<32x128xf32>
    %cst_12 = arith.constant 2.000000e-01 : f32
    %31 = vector.broadcast %cst_12 : f32 to vector<32x128xf32>
    %32 = arith.mulf %31, %30 : vector<32x128xf32>
    %33 = arith.maximumf %30, %32 : vector<32x128xf32>
    %34 = arith.truncf %33 : vector<32x128xf32> to vector<32x128xbf16>
    %c0_13 = arith.constant 0 : index
    %c0_14 = arith.constant 0 : index
    %35 = vector.load %arg5[%c0_13, %c0_14] : memref<32x128xbf16, #tpu.memory_space<vmem>>, vector<32x128xbf16>
    tpu.vector_store %arg5[%c0_13, %c0_14], %34 {strides = array<i32>} : memref<32x128xbf16, #tpu.memory_space<vmem>>, vector<32x128xbf16>,
    return
  }
  func.func @transform_0(%arg0: i32) -> (i32, i32) {
    %c0_i32 = arith.constant 0 : i32
    %c0_i32_0 = arith.constant 0 : i32
    %c0_i32_1 = arith.constant 0 : i32
    return %c0_i32, %c0_i32_0 : i32, i32
  }
  func.func @transform_1(%arg0: i32) -> (i32, i32) {
    %c0_i32 = arith.constant 0 : i32
    %c0_i32_0 = arith.constant 0 : i32
    %c0_i32_1 = arith.constant 0 : i32
    return %c0_i32, %c0_i32_0 : i32, i32
  }
  func.func @transform_2(%arg0: i32) -> (i32, i32) {
    %c0_i32 = arith.constant 0 : i32
    %c0_i32_0 = arith.constant 0 : i32
    %c0_i32_1 = arith.constant 0 : i32
    return %c0_i32, %c0_i32_0 : i32, i32
  }
  func.func @transform_3(%arg0: i32) -> (i32, i32) {
    %c0_i32 = arith.constant 0 : i32
    %c0_i32_0 = arith.constant 0 : i32
    %c0_i32_1 = arith.constant 0 : i32
    return %c0_i32, %c0_i32_0 : i32, i32
  }
  func.func @transform_4(%arg0: i32) -> (i32, i32) {
    %c0_i32 = arith.constant 0 : i32
    %c0_i32_0 = arith.constant 0 : i32
    %c0_i32_1 = arith.constant 0 : i32
    return %c0_i32, %c0_i32_0 : i32, i32
  }
}

module attributes {stable_mosaic.version = 11 : i64} {
  func.func @_conv_bn_leaky_kernel(%arg0: i32, %arg1: memref<64x512xbf16, #tpu.memory_space<vmem>>, %arg2: memref<512x128xbf16, #tpu.memory_space<vmem>>, %arg3: memref<64x1xf32, #tpu.memory_space<vmem>>, %arg4: memref<64x1xf32, #tpu.memory_space<vmem>>, %arg5: memref<64x128xbf16, #tpu.memory_space<vmem>>) attributes {dimension_semantics = [#tpu.dimension_semantics<arbitrary>], iteration_bounds = array<i64: 1>, scalar_prefetch = 0 : i64, scratch_operands = 0 : i64, tpu.core_type = #tpu.core_type<tc>, window_params = [{pipeline_mode = #tpu.pipeline_mode<synchronous>, transform_indices = @transform_0, window_bounds = array<i64: 64, 512>}, {pipeline_mode = #tpu.pipeline_mode<synchronous>, transform_indices = @transform_1, window_bounds = array<i64: 512, 128>}, {pipeline_mode = #tpu.pipeline_mode<synchronous>, transform_indices = @transform_2, window_bounds = array<i64: 64, 1>}, {pipeline_mode = #tpu.pipeline_mode<synchronous>, transform_indices = @transform_3, window_bounds = array<i64: 64, 1>}, {pipeline_mode = #tpu.pipeline_mode<synchronous>, transform_indices = @transform_4, window_bounds = array<i64: 64, 128>}]} {
    %c0 = arith.constant 0 : index
    %c0_0 = arith.constant 0 : index
    %0 = vector.load %arg1[%c0, %c0_0] : memref<64x512xbf16, #tpu.memory_space<vmem>>, vector<64x512xbf16>
    %c0_1 = arith.constant 0 : index
    %c0_2 = arith.constant 0 : index
    %1 = vector.load %arg2[%c0_1, %c0_2] : memref<512x128xbf16, #tpu.memory_space<vmem>>, vector<512x128xbf16>
    %cst = arith.constant dense<0.000000e+00> : vector<64x128xf32>
    %2 = tpu.matmul %0, %1, %cst {dimension_numbers = #tpu.dot_dimension_numbers<[1], [0], [0], [1], [0, 0, 1, 1], [], []>} : vector<64x512xbf16>, vector<512x128xbf16>, vector<64x128xf32> -> vector<64x128xf32>
    %3 = tpu.iota {dimensions = array<i32: 1>} : vector<64x128xi32>
    %c32_i32 = arith.constant 32 : i32
    %4 = vector.broadcast %c32_i32 : i32 to vector<64x128xi32>
    %5 = arith.cmpi slt, %3, %4 : vector<64x128xi32>
    %6 = arith.extui %5 : vector<64x128xi1> to vector<64x128xi32>
    %7 = arith.sitofp %6 : vector<64x128xi32> to vector<64x128xf32>
    %8 = arith.mulf %2, %7 : vector<64x128xf32>
    %cst_3 = arith.constant dense<0.000000e+00> : vector<64xf32>
    %9 = vector.multi_reduction <add>, %8, %cst_3 [1] : vector<64x128xf32> to vector<64xf32>
    %10 = vector.shape_cast %9 : vector<64xf32> to vector<64x1xf32>
    %cst_4 = arith.constant 3.125000e-02 : f32
    %11 = vector.broadcast %cst_4 : f32 to vector<64x1xf32>
    %12 = arith.mulf %10, %11 : vector<64x1xf32>
    %13 = vector.broadcast %12 : vector<64x1xf32> to vector<64x128xf32>
    %14 = arith.subf %2, %13 : vector<64x128xf32>
    %15 = arith.mulf %14, %7 : vector<64x128xf32>
    %16 = arith.mulf %15, %15 : vector<64x128xf32>
    %cst_5 = arith.constant dense<0.000000e+00> : vector<64xf32>
    %17 = vector.multi_reduction <add>, %16, %cst_5 [1] : vector<64x128xf32> to vector<64xf32>
    %18 = vector.shape_cast %17 : vector<64xf32> to vector<64x1xf32>
    %cst_6 = arith.constant 3.125000e-02 : f32
    %19 = vector.broadcast %cst_6 : f32 to vector<64x1xf32>
    %20 = arith.mulf %18, %19 : vector<64x1xf32>
    %c0_7 = arith.constant 0 : index
    %c0_8 = arith.constant 0 : index
    %21 = vector.load %arg3[%c0_7, %c0_8] : memref<64x1xf32, #tpu.memory_space<vmem>>, vector<64x1xf32>
    %cst_9 = arith.constant 9.99999974E-6 : f32
    %22 = vector.broadcast %cst_9 : f32 to vector<64x1xf32>
    %23 = arith.addf %20, %22 : vector<64x1xf32>
    %24 = math.rsqrt %23 : vector<64x1xf32>
    %25 = arith.mulf %21, %24 : vector<64x1xf32>
    %26 = vector.broadcast %25 : vector<64x1xf32> to vector<64x128xf32>
    %27 = arith.mulf %15, %26 : vector<64x128xf32>
    %c0_10 = arith.constant 0 : index
    %c0_11 = arith.constant 0 : index
    %28 = vector.load %arg4[%c0_10, %c0_11] : memref<64x1xf32, #tpu.memory_space<vmem>>, vector<64x1xf32>
    %29 = vector.broadcast %28 : vector<64x1xf32> to vector<64x128xf32>
    %30 = arith.addf %27, %29 : vector<64x128xf32>
    %cst_12 = arith.constant 2.000000e-01 : f32
    %31 = vector.broadcast %cst_12 : f32 to vector<64x128xf32>
    %32 = arith.mulf %31, %30 : vector<64x128xf32>
    %33 = arith.maximumf %30, %32 : vector<64x128xf32>
    %34 = arith.truncf %33 : vector<64x128xf32> to vector<64x128xbf16>
    %c0_13 = arith.constant 0 : index
    %c0_14 = arith.constant 0 : index
    %35 = vector.load %arg5[%c0_13, %c0_14] : memref<64x128xbf16, #tpu.memory_space<vmem>>, vector<64x128xbf16>
    tpu.vector_store %arg5[%c0_13, %c0_14], %34 {strides = array<i32>} : memref<64x128xbf16, #tpu.memory_space<vmem>>, vector<64x128xbf16>,
    return
  }
  func.func @transform_0(%arg0: i32) -> (i32, i32) {
    %c0_i32 = arith.constant 0 : i32
    %c0_i32_0 = arith.constant 0 : i32
    %c0_i32_1 = arith.constant 0 : i32
    return %c0_i32, %c0_i32_0 : i32, i32
  }
  func.func @transform_1(%arg0: i32) -> (i32, i32) {
    %c0_i32 = arith.constant 0 : i32
    %c0_i32_0 = arith.constant 0 : i32
    %c0_i32_1 = arith.constant 0 : i32
    return %c0_i32, %c0_i32_0 : i32, i32
  }
  func.func @transform_2(%arg0: i32) -> (i32, i32) {
    %c0_i32 = arith.constant 0 : i32
    %c0_i32_0 = arith.constant 0 : i32
    %c0_i32_1 = arith.constant 0 : i32
    return %c0_i32, %c0_i32_0 : i32, i32
  }
  func.func @transform_3(%arg0: i32) -> (i32, i32) {
    %c0_i32 = arith.constant 0 : i32
    %c0_i32_0 = arith.constant 0 : i32
    %c0_i32_1 = arith.constant 0 : i32
    return %c0_i32, %c0_i32_0 : i32, i32
  }
  func.func @transform_4(%arg0: i32) -> (i32, i32) {
    %c0_i32 = arith.constant 0 : i32
    %c0_i32_0 = arith.constant 0 : i32
    %c0_i32_1 = arith.constant 0 : i32
    return %c0_i32, %c0_i32_0 : i32, i32
  }
}

module attributes {stable_mosaic.version = 11 : i64} {
  func.func @_conv_act_kernel(%arg0: i32, %arg1: memref<8x1024xbf16, #tpu.memory_space<vmem>>, %arg2: memref<1024x128xbf16, #tpu.memory_space<vmem>>, %arg3: memref<8x128xf32, #tpu.memory_space<vmem>>) attributes {dimension_semantics = [#tpu.dimension_semantics<parallel>], iteration_bounds = array<i64: 1>, scalar_prefetch = 0 : i64, scratch_operands = 0 : i64, tpu.core_type = #tpu.core_type<tc>, window_params = [{pipeline_mode = #tpu.pipeline_mode<synchronous>, transform_indices = @transform_0, window_bounds = array<i64: 8, 1024>}, {transform_indices = @transform_1, window_bounds = array<i64: 1024, 128>}, {transform_indices = @transform_2, window_bounds = array<i64: 8, 128>}]} {
    %c0 = arith.constant 0 : index
    %c0_0 = arith.constant 0 : index
    %0 = vector.load %arg1[%c0, %c0_0] : memref<8x1024xbf16, #tpu.memory_space<vmem>>, vector<8x1024xbf16>
    %c0_1 = arith.constant 0 : index
    %c0_2 = arith.constant 0 : index
    %1 = vector.load %arg2[%c0_1, %c0_2] : memref<1024x128xbf16, #tpu.memory_space<vmem>>, vector<1024x128xbf16>
    %cst = arith.constant dense<0.000000e+00> : vector<8x128xf32>
    %2 = tpu.matmul %0, %1, %cst {dimension_numbers = #tpu.dot_dimension_numbers<[1], [0], [0], [1], [0, 0, 1, 1], [], []>} : vector<8x1024xbf16>, vector<1024x128xbf16>, vector<8x128xf32> -> vector<8x128xf32>
    %cst_3 = arith.constant 0.000000e+00 : f32
    %3 = vector.broadcast %cst_3 : f32 to vector<8x128xf32>
    %4 = arith.subf %3, %2 : vector<8x128xf32>
    %5 = math.exp %4 : vector<8x128xf32>
    %cst_4 = arith.constant 1.000000e+00 : f32
    %6 = vector.broadcast %cst_4 : f32 to vector<8x128xf32>
    %7 = arith.addf %6, %5 : vector<8x128xf32>
    %cst_5 = arith.constant 1.000000e+00 : f32
    %8 = vector.broadcast %cst_5 : f32 to vector<8x128xf32>
    %9 = arith.divf %8, %7 : vector<8x128xf32>
    %c0_6 = arith.constant 0 : index
    %c0_7 = arith.constant 0 : index
    %10 = vector.load %arg3[%c0_6, %c0_7] : memref<8x128xf32, #tpu.memory_space<vmem>>, vector<8x128xf32>
    tpu.vector_store %arg3[%c0_6, %c0_7], %9 {strides = array<i32>} : memref<8x128xf32, #tpu.memory_space<vmem>>, vector<8x128xf32>,
    return
  }
  func.func @transform_0(%arg0: i32) -> (i32, i32) {
    %c0_i32 = arith.constant 0 : i32
    %c0_i32_0 = arith.constant 0 : i32
    %c0_i32_1 = arith.constant 0 : i32
    return %c0_i32, %c0_i32_0 : i32, i32
  }
  func.func @transform_1(%arg0: i32) -> (i32, i32) {
    %c0_i32 = arith.constant 0 : i32
    %c0_i32_0 = arith.constant 0 : i32
    return %c0_i32, %arg0 : i32, i32
  }
  func.func @transform_2(%arg0: i32) -> (i32, i32) {
    %c0_i32 = arith.constant 0 : i32
    %c0_i32_0 = arith.constant 0 : i32
    return %c0_i32, %arg0 : i32, i32
  }
}

</mosaic_0001>

<bundles_post_ra>
// kernel: netd_forward.5
= control target key start
LH: loop header
LB: loop body
LE: loop exit
PB: predicated region body
PF: predicated region fallthrough
CT: control target
= control target key end

     0   :  { %s1264_s9 = smov 0   ;;  %s1266_s10 = smov 0   ;;  %s1597_s0 = inlined_call_operand.vmem [shape: bf16[8,128], index: 0, kind: input, shape index: {}]   ;;  %s1598_s1 = inlined_call_operand.vmem [shape: bf16[128,2048], index: 1, kind: input, shape index: {}]   ;;  %s1599_s2 = inlined_call_operand.vmem [shape: bf16[8,2048], index: 2, kind: output, shape index: {}]  }
   0x1   :  { %s1268_s11 = smov 0  }
   0x2 LB: > { %s867_s12 = sadd.s32 4294967295, %s1247_s11   ;;  %s1281_s13 = sadd.s32 1, %s1247_s11   ;;  %s1247_s11 = sphi %s1268_s11, %s1602_s11   ;;  %s1243_s10 = sphi %s1266_s10, %s1601_s10   ;;  %s1239_s9 = sphi %s1264_s9, %s1600_s9  }
   0x3   : > { %s37_s14 = ssub.s32 %s1247_s11, %s1281_s13  ;;  %s40_s15 = sadd.s32 1, %s1243_s10 }
   0x4   : > { %p38_p0 = scmp.eq.s32.totalorder %s37_s14, 0  ;;  %p47_p1 = scmp.ne.s32.totalorder %s1243_s10, %s1239_s9 }
   0x5   : > { %p48_p2 = scmp.eq.s32.totalorder %s1247_s11, 0  ;;  %p870_p4 = scmp.ge.s32.totalorder %s1247_s11, 2 }
   0x6   : > { %s1290_s16 = scalar_select %p38_p0, %s1243_s10, %s40_s15  }
   0x7   : > { %p49_p3 = por %p48_p2, %p47_p1  ;;  %102 = sbr.rel (%p870_p4) target bundleno = 80 (0x50), region = 20 }
   0xc   : > { %105 = sbr.rel (!%p49_p3) target bundleno = 80 (0x50), region = 24  ;;  %s107_s17 = sand.u32 (%p49_p3), 1, %s1243_s10  }
   0xd   : > { %s1136_s18 = sshll.u32 (%p49_p3), %s1247_s11, 5  ;;  %s871_s19 = sshll.u32 (%p49_p3), %s107_s17, 9 }
   0xe   : > { %s1298_s22 = scalar_lea.vmem (%p49_p3), %s1598_s1, %s1136_s18  ;;  %s1303_s23 = scalar_lea.vmem (%p49_p3), [#allocation2], %s871_s19 }
   0xf   : > { %v125_v0 = vld [vmem:[%s1298_s22] sm:$0xff] (%p49_p3)  ;;  %v127_v1 = vld [vmem:[%s1298_s22 + $0x8] sm:$0xff] (%p49_p3)  ;;  %v129_v2 = vld [vmem:[%s1298_s22 + $0x10] sm:$0xff] (%p49_p3) }
  0x10   : > { %126 = vst [vmem:[%s1303_s23] sm:$0xff] (%p49_p3), %v125_v0  ;;  %v131_v3 = vld [vmem:[%s1298_s22 + $0x18] sm:$0xff] (%p49_p3)  ;;  %v133_v4 = vld [vmem:[%s1298_s22 + $0x40] sm:$0xff] (%p49_p3)  ;;  %v135_v5 = vld [vmem:[%s1298_s22 + $0x48] sm:$0xff] (%p49_p3) }
  0x11   : > { %128 = vst [vmem:[%s1303_s23 + $0x8] sm:$0xff] %v127_v1  ;;  %v137_v6 = vld [vmem:[%s1298_s22 + $0x50] sm:$0xff]  ;;  %v139_v7 = vld [vmem:[%s1298_s22 + $0x58] sm:$0xff]  ;;  %v141_v8 = vld [vmem:[%s1298_s22 + $0x80] sm:$0xff] }
  0x12   : > { %130 = vst [vmem:[%s1303_s23 + $0x10] sm:$0xff] %v129_v2  ;;  %v143_v9 = vld [vmem:[%s1298_s22 + $0x88] sm:$0xff]  ;;  %v145_v10 = vld [vmem:[%s1298_s22 + $0x90] sm:$0xff]  ;;  %v147_v11 = vld [vmem:[%s1298_s22 + $0x98] sm:$0xff] }
  0x13   : > { %132 = vst [vmem:[%s1303_s23 + $0x18] sm:$0xff] %v131_v3  ;;  %v149_v12 = vld [vmem:[%s1298_s22 + $0xc0] sm:$0xff]  ;;  %v151_v13 = vld [vmem:[%s1298_s22 + $0xc8] sm:$0xff]  ;;  %v153_v14 = vld [vmem:[%s1298_s22 + $0xd0] sm:$0xff] }
  0x14   : > { %134 = vst [vmem:[%s1303_s23 + $0x20] sm:$0xff] %v133_v4  ;;  %v155_v15 = vld [vmem:[%s1298_s22 + $0xd8] sm:$0xff]  ;;  %v157_v16 = vld [vmem:[%s1298_s22 + $0x100] sm:$0xff]  ;;  %v159_v17 = vld [vmem:[%s1298_s22 + $0x108] sm:$0xff] }
  0x15   : > { %136 = vst [vmem:[%s1303_s23 + $0x28] sm:$0xff] %v135_v5  ;;  %v161_v18 = vld [vmem:[%s1298_s22 + $0x110] sm:$0xff]  ;;  %v163_v19 = vld [vmem:[%s1298_s22 + $0x118] sm:$0xff]  ;;  %v165_v20 = vld [vmem:[%s1298_s22 + $0x140] sm:$0xff] }
  0x16   : > { %138 = vst [vmem:[%s1303_s23 + $0x30] sm:$0xff] %v137_v6  ;;  %v167_v21 = vld [vmem:[%s1298_s22 + $0x148] sm:$0xff]  ;;  %v169_v22 = vld [vmem:[%s1298_s22 + $0x150] sm:$0xff]  ;;  %v171_v23 = vld [vmem:[%s1298_s22 + $0x158] sm:$0xff] }
  0x17   : > { %140 = vst [vmem:[%s1303_s23 + $0x38] sm:$0xff] %v139_v7  ;;  %v173_v24 = vld [vmem:[%s1298_s22 + $0x180] sm:$0xff]  ;;  %v175_v25 = vld [vmem:[%s1298_s22 + $0x188] sm:$0xff]  ;;  %v177_v26 = vld [vmem:[%s1298_s22 + $0x190] sm:$0xff] }
  0x18   : > { %142 = vst [vmem:[%s1303_s23 + $0x40] sm:$0xff] %v141_v8  ;;  %v179_v27 = vld [vmem:[%s1298_s22 + $0x198] sm:$0xff]  ;;  %v181_v28 = vld [vmem:[%s1298_s22 + $0x1c0] sm:$0xff]  ;;  %v183_v29 = vld [vmem:[%s1298_s22 + $0x1c8] sm:$0xff] }
  0x19   : > { %144 = vst [vmem:[%s1303_s23 + $0x48] sm:$0xff] %v143_v9  ;;  %v185_v30 = vld [vmem:[%s1298_s22 + $0x1d0] sm:$0xff]  ;;  %v187_v31 = vld [vmem:[%s1298_s22 + $0x1d8] sm:$0xff]  ;;  %v189_v32 = vld [vmem:[%s1298_s22 + $0x200] sm:$0xff] }
  0x1a   : > { %146 = vst [vmem:[%s1303_s23 + $0x50] sm:$0xff] %v145_v10  ;;  %v191_v33 = vld [vmem:[%s1298_s22 + $0x208] sm:$0xff]  ;;  %v193_v34 = vld [vmem:[%s1298_s22 + $0x210] sm:$0xff]  ;;  %v195_v35 = vld [vmem:[%s1298_s22 + $0x218] sm:$0xff] }
  0x1b   : > { %148 = vst [vmem:[%s1303_s23 + $0x58] sm:$0xff] %v147_v11  ;;  %v197_v36 = vld [vmem:[%s1298_s22 + $0x240] sm:$0xff]  ;;  %v199_v37 = vld [vmem:[%s1298_s22 + $0x248] sm:$0xff]  ;;  %v201_v38 = vld [vmem:[%s1298_s22 + $0x250] sm:$0xff] }
  0x1c   : > { %150 = vst [vmem:[%s1303_s23 + $0x60] sm:$0xff] %v149_v12  ;;  %v203_v39 = vld [vmem:[%s1298_s22 + $0x258] sm:$0xff]  ;;  %v205_v40 = vld [vmem:[%s1298_s22 + $0x280] sm:$0xff]  ;;  %v207_v41 = vld [vmem:[%s1298_s22 + $0x288] sm:$0xff] }
  0x1d   : > { %152 = vst [vmem:[%s1303_s23 + $0x68] sm:$0xff] %v151_v13  ;;  %v209_v42 = vld [vmem:[%s1298_s22 + $0x290] sm:$0xff]  ;;  %v211_v43 = vld [vmem:[%s1298_s22 + $0x298] sm:$0xff]  ;;  %v213_v44 = vld [vmem:[%s1298_s22 + $0x2c0] sm:$0xff] }
  0x1e   : > { %154 = vst [vmem:[%s1303_s23 + $0x70] sm:$0xff] %v153_v14  ;;  %v215_v45 = vld [vmem:[%s1298_s22 + $0x2c8] sm:$0xff]  ;;  %v217_v46 = vld [vmem:[%s1298_s22 + $0x2d0] sm:$0xff]  ;;  %v219_v47 = vld [vmem:[%s1298_s22 + $0x2d8] sm:$0xff] }
  0x1f   : > { %156 = vst [vmem:[%s1303_s23 + $0x78] sm:$0xff] %v155_v15  ;;  %v221_v48 = vld [vmem:[%s1298_s22 + $0x300] sm:$0xff]  ;;  %v223_v49 = vld [vmem:[%s1298_s22 + $0x308] sm:$0xff]  ;;  %v225_v50 = vld [vmem:[%s1298_s22 + $0x310] sm:$0xff] }
  0x20   : > { %158 = vst [vmem:[%s1303_s23 + $0x80] sm:$0xff] %v157_v16  ;;  %v227_v51 = vld [vmem:[%s1298_s22 + $0x318] sm:$0xff]  ;;  %v229_v52 = vld [vmem:[%s1298_s22 + $0x340] sm:$0xff]  ;;  %v231_v53 = vld [vmem:[%s1298_s22 + $0x348] sm:$0xff] }
  0x21   : > { %160 = vst [vmem:[%s1303_s23 + $0x88] sm:$0xff] %v159_v17  ;;  %v233_v54 = vld [vmem:[%s1298_s22 + $0x350] sm:$0xff]  ;;  %v235_v55 = vld [vmem:[%s1298_s22 + $0x358] sm:$0xff]  ;;  %v237_v56 = vld [vmem:[%s1298_s22 + $0x380] sm:$0xff] }
  0x22   : > { %162 = vst [vmem:[%s1303_s23 + $0x90] sm:$0xff] %v161_v18  ;;  %v239_v57 = vld [vmem:[%s1298_s22 + $0x388] sm:$0xff]  ;;  %v241_v58 = vld [vmem:[%s1298_s22 + $0x390] sm:$0xff]  ;;  %v243_v59 = vld [vmem:[%s1298_s22 + $0x398] sm:$0xff] }
  0x23   : > { %164 = vst [vmem:[%s1303_s23 + $0x98] sm:$0xff] %v163_v19  ;;  %v245_v60 = vld [vmem:[%s1298_s22 + $0x3c0] sm:$0xff]  ;;  %v247_v61 = vld [vmem:[%s1298_s22 + $0x3c8] sm:$0xff]  ;;  %v249_v62 = vld [vmem:[%s1298_s22 + $0x3d0] sm:$0xff] }
  0x24   : > { %166 = vst [vmem:[%s1303_s23 + $0xa0] sm:$0xff] %v165_v20  ;;  %v251_v63 = vld [vmem:[%s1298_s22 + $0x3d8] sm:$0xff] }
  0x25   : > { %168 = vst [vmem:[%s1303_s23 + $0xa8] sm:$0xff] %v167_v21 }
  0x26   : > { %170 = vst [vmem:[%s1303_s23 + $0xb0] sm:$0xff] %v169_v22 }
  0x27   : > { %172 = vst [vmem:[%s1303_s23 + $0xb8] sm:$0xff] %v171_v23 }
  0x28   : > { %174 = vst [vmem:[%s1303_s23 + $0xc0] sm:$0xff] %v173_v24 }
  0x29   : > { %176 = vst [vmem:[%s1303_s23 + $0xc8] sm:$0xff] %v175_v25 }
  0x2a   : > { %178 = vst [vmem:[%s1303_s23 + $0xd0] sm:$0xff] %v177_v26 }
  0x2b   : > { %180 = vst [vmem:[%s1303_s23 + $0xd8] sm:$0xff] %v179_v27 }
  0x2c   : > { %182 = vst [vmem:[%s1303_s23 + $0xe0] sm:$0xff] %v181_v28 }
  0x2d   : > { %184 = vst [vmem:[%s1303_s23 + $0xe8] sm:$0xff] %v183_v29 }
  0x2e   : > { %186 = vst [vmem:[%s1303_s23 + $0xf0] sm:$0xff] %v185_v30 }
  0x2f   : > { %188 = vst [vmem:[%s1303_s23 + $0xf8] sm:$0xff] %v187_v31 }
  0x30   : > { %190 = vst [vmem:[%s1303_s23 + $0x100] sm:$0xff] %v189_v32 }
  0x31   : > { %192 = vst [vmem:[%s1303_s23 + $0x108] sm:$0xff] %v191_v33 }
  0x32   : > { %194 = vst [vmem:[%s1303_s23 + $0x110] sm:$0xff] %v193_v34 }
  0x33   : > { %196 = vst [vmem:[%s1303_s23 + $0x118] sm:$0xff] %v195_v35 }
  0x34   : > { %198 = vst [vmem:[%s1303_s23 + $0x120] sm:$0xff] %v197_v36 }
  0x35   : > { %200 = vst [vmem:[%s1303_s23 + $0x128] sm:$0xff] %v199_v37 }
  0x36   : > { %202 = vst [vmem:[%s1303_s23 + $0x130] sm:$0xff] %v201_v38 }
  0x37   : > { %204 = vst [vmem:[%s1303_s23 + $0x138] sm:$0xff] %v203_v39 }
  0x38   : > { %206 = vst [vmem:[%s1303_s23 + $0x140] sm:$0xff] %v205_v40 }
  0x39   : > { %208 = vst [vmem:[%s1303_s23 + $0x148] sm:$0xff] %v207_v41 }
  0x3a   : > { %210 = vst [vmem:[%s1303_s23 + $0x150] sm:$0xff] %v209_v42 }
  0x3b   : > { %212 = vst [vmem:[%s1303_s23 + $0x158] sm:$0xff] %v211_v43 }
  0x3c   : > { %214 = vst [vmem:[%s1303_s23 + $0x160] sm:$0xff] %v213_v44 }
  0x3d   : > { %216 = vst [vmem:[%s1303_s23 + $0x168] sm:$0xff] %v215_v45 }
  0x3e   : > { %218 = vst [vmem:[%s1303_s23 + $0x170] sm:$0xff] %v217_v46 }
  0x3f   : > { %220 = vst [vmem:[%s1303_s23 + $0x178] sm:$0xff] %v219_v47 }
  0x40   : > { %222 = vst [vmem:[%s1303_s23 + $0x180] sm:$0xff] %v221_v48 }
  0x41   : > { %224 = vst [vmem:[%s1303_s23 + $0x188] sm:$0xff] %v223_v49 }
  0x42   : > { %226 = vst [vmem:[%s1303_s23 + $0x190] sm:$0xff] %v225_v50 }
  0x43   : > { %228 = vst [vmem:[%s1303_s23 + $0x198] sm:$0xff] %v227_v51 }
  0x44   : > { %230 = vst [vmem:[%s1303_s23 + $0x1a0] sm:$0xff] %v229_v52 }
  0x45   : > { %232 = vst [vmem:[%s1303_s23 + $0x1a8] sm:$0xff] %v231_v53 }
  0x46   : > { %234 = vst [vmem:[%s1303_s23 + $0x1b0] sm:$0xff] %v233_v54 }
  0x47   : > { %236 = vst [vmem:[%s1303_s23 + $0x1b8] sm:$0xff] %v235_v55 }
  0x48   : > { %238 = vst [vmem:[%s1303_s23 + $0x1c0] sm:$0xff] %v237_v56 }
  0x49   : > { %240 = vst [vmem:[%s1303_s23 + $0x1c8] sm:$0xff] %v239_v57 }
  0x4a   : > { %242 = vst [vmem:[%s1303_s23 + $0x1d0] sm:$0xff] %v241_v58 }
  0x4b   : > { %244 = vst [vmem:[%s1303_s23 + $0x1d8] sm:$0xff] %v243_v59 }
  0x4c   : > { %246 = vst [vmem:[%s1303_s23 + $0x1e0] sm:$0xff] %v245_v60 }
  0x4d   : > { %248 = vst [vmem:[%s1303_s23 + $0x1e8] sm:$0xff] %v247_v61 }
  0x4e   : > { %250 = vst [vmem:[%s1303_s23 + $0x1f0] sm:$0xff] %v249_v62 }
  0x4f   : > { %252 = vst [vmem:[%s1303_s23 + $0x1f8] sm:$0xff] %v251_v63 }
  0x50 PF: > { %p874_p5 = scmp.ge.s32.totalorder %s1247_s11, 1  ;;  %p257_p6 = scmp.lt.s32.totalorder %s1247_s11, 3 }
  0x52   : > { %p258_p7 = pnand %p874_p5, %p257_p6 }
  0x53   : > { %s264_s24 = sand.u32 (!%p258_p7), 1, %s1239_s9   ;;  %s876_s29 = sshll.u32 (!%p258_p7), %s867_s12, 3 }
  0x54   : > { %261 = sbr.rel (%p258_p7) target bundleno = 298 (0x12a), region = 47  ;;  %s875_s25 = sshll.u32 (!%p258_p7), %s264_s24, 9 }
  0x55   : > { %s1433_s26 = scalar_lea.vmem (!%p258_p7), [#allocation2], %s875_s25  ;;  %p287_p8 = scmp.lt.s32.totalorder (!%p258_p7), %s876_s29, 15 }
  0x59   : > { %v1104_v0 = vld [vmem:[%s1433_s26 + $0x1c0] sm:$0xf]  ;;  %v1193_v2 = vld [vmem:[%s1433_s26 + $0x1c4] sm:$0xf]  ;;  %v1112_v5 = vld [vmem:[%s1433_s26 + $0x1c8] sm:$0xf] }
  0x5a   : > { %v1197_v1 = vld [vmem:[%s1433_s26 + $0x1dc] sm:$0xf0]  ;;  %v1106_v4 = vld [vmem:[%s1433_s26 + $0x1e0] sm:$0xf0]  ;;  %v1198_v6 = vld [vmem:[%s1433_s26 + $0x1e4] sm:$0xf0] }
  0x5b   : > { %v1105_v3 = vor.u32 %v1197_v1, %v1104_v0  ;;  %v1109_v7 = vor.u32 %v1193_v2, %v1106_v4  ;;  %v1113_v8 = vor.u32 %v1198_v6, %v1112_v5  ;;  %v1194_v9 = vld [vmem:[%s1433_s26 + $0x1cc] sm:$0xf]  ;;  %v1072_v11 = vld [vmem:[%s1433_s26 + $0x180] sm:$0xf]  ;;  %v1185_v14 = vld [vmem:[%s1433_s26 + $0x184] sm:$0xf] }
  0x5c   : > { %v1114_v10 = vld [vmem:[%s1433_s26 + $0x1e8] sm:$0xf0]  ;;  %v1189_v13 = vld [vmem:[%s1433_s26 + $0x19c] sm:$0xf0]  ;;  %v1074_v15 = vld [vmem:[%s1433_s26 + $0x1a0] sm:$0xf0] }
  0x5d   : > { %677 = vmatpush.bf16.msra.mxu0 %v1105_v3  ;;  %v1117_v12 = vor.u32 %v1194_v9, %v1114_v10  ;;  %690 = vmatpush.bf16.msra.mxu1 %v1109_v7  ;;  %v1073_v16 = vor.u32 %v1189_v13, %v1072_v11  ;;  %v1077_v17 = vor.u32 %v1185_v14, %v1074_v15  ;;  %v1080_v18 = vld [vmem:[%s1433_s26 + $0x188] sm:$0xf]  ;;  %v1186_v20 = vld [vmem:[%s1433_s26 + $0x18c] sm:$0xf]  ;;  %v1040_v23 = vld [vmem:[%s1433_s26 + $0x140] sm:$0xf] }
  0x5e   : > { %703 = vmatpush.bf16.msra.mxu2 %v1113_v8  ;;  %v1190_v19 = vld [vmem:[%s1433_s26 + $0x1a4] sm:$0xf0]  ;;  %v1082_v22 = vld [vmem:[%s1433_s26 + $0x1a8] sm:$0xf0]  ;;  %v1181_v24 = vld [vmem:[%s1433_s26 + $0x15c] sm:$0xf0] }
  0x5f   : > { %716 = vmatpush.bf16.msra.mxu3 %v1117_v12  ;;  %v1081_v21 = vor.u32 %v1190_v19, %v1080_v18  ;;  %v1085_v25 = vor.u32 %v1186_v20, %v1082_v22  ;;  %v1177_v26 = vld [vmem:[%s1433_s26 + $0x144] sm:$0xf]  ;;  %v1048_v28 = vld [vmem:[%s1433_s26 + $0x148] sm:$0xf]  ;;  %v1041_v29 = vor.u32 %v1181_v24, %v1040_v23  ;;  %v1178_v31 = vld [vmem:[%s1433_s26 + $0x14c] sm:$0xf] }
  0x60   : > { %v1042_v27 = vld [vmem:[%s1433_s26 + $0x160] sm:$0xf0]  ;;  %v1182_v30 = vld [vmem:[%s1433_s26 + $0x164] sm:$0xf0]  ;;  %v1050_v32 = vld [vmem:[%s1433_s26 + $0x168] sm:$0xf0] }
  0x61   : > { %678 = vmatpush.bf16.msra.mxu0 %v1073_v16  ;;  %691 = vmatpush.bf16.msra.mxu1 %v1077_v17  ;;  %v1045_v33 = vor.u32 %v1177_v26, %v1042_v27  ;;  %v1049_v34 = vor.u32 %v1182_v30, %v1048_v28  ;;  %v1008_v35 = vld [vmem:[%s1433_s26 + $0x100] sm:$0xf]  ;;  %v1169_v37 = vld [vmem:[%s1433_s26 + $0x104] sm:$0xf]  ;;  %v1053_v38 = vor.u32 %v1178_v31, %v1050_v32  ;;  %v1016_v40 = vld [vmem:[%s1433_s26 + $0x108] sm:$0xf] }
  0x62   : > { %704 = vmatpush.bf16.msra.mxu2 %v1081_v21  ;;  %v1173_v36 = vld [vmem:[%s1433_s26 + $0x11c] sm:$0xf0]  ;;  %v1010_v39 = vld [vmem:[%s1433_s26 + $0x120] sm:$0xf0]  ;;  %v1174_v41 = vld [vmem:[%s1433_s26 + $0x124] sm:$0xf0] }
  0x63   : > { %717 = vmatpush.bf16.msra.mxu3 %v1085_v25  ;;  %v1170_v42 = vld [vmem:[%s1433_s26 + $0x10c] sm:$0xf]  ;;  %v1009_v44 = vor.u32 %v1173_v36, %v1008_v35  ;;  %v1013_v45 = vor.u32 %v1169_v37, %v1010_v39  ;;  %v1017_v46 = vor.u32 %v1174_v41, %v1016_v40  ;;  %v976_v47 = vld [vmem:[%s1433_s26 + $0xc0] sm:$0xf]  ;;  %v1161_v49 = vld [vmem:[%s1433_s26 + $0xc4] sm:$0xf] }
  0x64   : > { %v1018_v43 = vld [vmem:[%s1433_s26 + $0x128] sm:$0xf0]  ;;  %v1165_v48 = vld [vmem:[%s1433_s26 + $0xdc] sm:$0xf0]  ;;  %v978_v51 = vld [vmem:[%s1433_s26 + $0xe0] sm:$0xf0] }
  0x65   : > { %679 = vmatpush.bf16.msra.mxu0 %v1041_v29  ;;  %692 = vmatpush.bf16.msra.mxu1 %v1045_v33  ;;  %v1021_v50 = vor.u32 %v1170_v42, %v1018_v43  ;;  %v984_v52 = vld [vmem:[%s1433_s26 + $0xc8] sm:$0xf]  ;;  %v1162_v54 = vld [vmem:[%s1433_s26 + $0xcc] sm:$0xf]  ;;  %v977_v56 = vor.u32 %v1165_v48, %v976_v47  ;;  %v981_v57 = vor.u32 %v1161_v49, %v978_v51  ;;  %v944_v59 = vld [vmem:[%s1433_s26 + $0x80] sm:$0xf] }
  0x66   : > { %705 = vmatpush.bf16.msra.mxu2 %v1049_v34  ;;  %v1166_v53 = vld [vmem:[%s1433_s26 + $0xe4] sm:$0xf0]  ;;  %v986_v55 = vld [vmem:[%s1433_s26 + $0xe8] sm:$0xf0]  ;;  %v1157_v60 = vld [vmem:[%s1433_s26 + $0x9c] sm:$0xf0] }
  0x67   : > { %718 = vmatpush.bf16.msra.mxu3 %v1053_v38  ;;  %v985_v58 = vor.u32 %v1166_v53, %v984_v52  ;;  %v1153_v61 = vld [vmem:[%s1433_s26 + $0x84] sm:$0xf]  ;;  %v989_v62 = vor.u32 %v1162_v54, %v986_v55  ;;  %v952_v0 = vld [vmem:[%s1433_s26 + $0x88] sm:$0xf]  ;;  %v1154_v2 = vld [vmem:[%s1433_s26 + $0x8c] sm:$0xf]  ;;  %v945_v4 = vor.u32 %v1157_v60, %v944_v59 }
  0x68   : > { %v946_v63 = vld [vmem:[%s1433_s26 + $0xa0] sm:$0xf0]  ;;  %v1158_v1 = vld [vmem:[%s1433_s26 + $0xa4] sm:$0xf0]  ;;  %v954_v3 = vld [vmem:[%s1433_s26 + $0xa8] sm:$0xf0] }
  0x69   : > { %680 = vmatpush.bf16.msra.mxu0 %v1009_v44  ;;  %693 = vmatpush.bf16.msra.mxu1 %v1013_v45  ;;  %v949_v5 = vor.u32 %v1153_v61, %v946_v63  ;;  %v953_v6 = vor.u32 %v1158_v1, %v952_v0  ;;  %v912_v7 = vld [vmem:[%s1433_s26 + $0x40] sm:$0xf]  ;;  %v1145_v9 = vld [vmem:[%s1433_s26 + $0x44] sm:$0xf]  ;;  %v957_v10 = vor.u32 %v1154_v2, %v954_v3  ;;  %v920_v12 = vld [vmem:[%s1433_s26 + $0x48] sm:$0xf] }
  0x6a   : > { %706 = vmatpush.bf16.msra.mxu2 %v1017_v46  ;;  %v1149_v8 = vld [vmem:[%s1433_s26 + $0x5c] sm:$0xf0]  ;;  %v914_v11 = vld [vmem:[%s1433_s26 + $0x60] sm:$0xf0]  ;;  %v1150_v13 = vld [vmem:[%s1433_s26 + $0x64] sm:$0xf0] }
  0x6b   : > { %719 = vmatpush.bf16.msra.mxu3 %v1021_v50  ;;  %v1146_v14 = vld [vmem:[%s1433_s26 + $0x4c] sm:$0xf]  ;;  %v913_v16 = vor.u32 %v1149_v8, %v912_v7  ;;  %v880_v17 = vld [vmem:[%s1433_s26] sm:$0xf]  ;;  %v917_v19 = vor.u32 %v1145_v9, %v914_v11  ;;  %v921_v20 = vor.u32 %v1150_v13, %v920_v12  ;;  %v1137_v21 = vld [vmem:[%s1433_s26 + $0x4] sm:$0xf] }
  0x6c   : > { %v922_v15 = vld [vmem:[%s1433_s26 + $0x68] sm:$0xf0]  ;;  %v1141_v18 = vld [vmem:[%s1433_s26 + $0x1c] sm:$0xf0]  ;;  %v882_v22 = vld [vmem:[%s1433_s26 + $0x20] sm:$0xf0] }
  0x6d   : > { %681 = vmatpush.bf16.msra.mxu0 %v977_v56  ;;  %694 = vmatpush.bf16.msra.mxu1 %v981_v57  ;;  %v888_v23 = vld [vmem:[%s1433_s26 + $0x8] sm:$0xf]  ;;  %v925_v24 = vor.u32 %v1146_v14, %v922_v15  ;;  %v1138_v26 = vld [vmem:[%s1433_s26 + $0xc] sm:$0xf]  ;;  %v1120_v28 = vld [vmem:[%s1433_s26 + $0x1d0] sm:$0xf]  ;;  %v881_v31 = vor.u32 %v1141_v18, %v880_v17  ;;  %v885_v35 = vor.u32 %v1137_v21, %v882_v22 }
  0x6e   : > { %707 = vmatpush.bf16.msra.mxu2 %v985_v58  ;;  %v1142_v25 = vld [vmem:[%s1433_s26 + $0x24] sm:$0xf0]  ;;  %v890_v27 = vld [vmem:[%s1433_s26 + $0x28] sm:$0xf0]  ;;  %v1199_v29 = vld [vmem:[%s1433_s26 + $0x1ec] sm:$0xf0] }
  0x6f   : > { %720 = vmatpush.bf16.msra.mxu3 %v989_v62  ;;  %v1195_v30 = vld [vmem:[%s1433_s26 + $0x1d4] sm:$0xf]  ;;  %v1128_v33 = vld [vmem:[%s1433_s26 + $0x1d8] sm:$0xf]  ;;  %v889_v36 = vor.u32 %v1142_v25, %v888_v23  ;;  %v1196_v37 = vld [vmem:[%s1433_s26 + $0x1dc] sm:$0xf]  ;;  %v893_v39 = vor.u32 %v1138_v26, %v890_v27  ;;  %v1121_v40 = vor.u32 %v1199_v29, %v1120_v28 }
  0x70   : > { %v1122_v32 = vld [vmem:[%s1433_s26 + $0x1f0] sm:$0xf0]  ;;  %v1200_v34 = vld [vmem:[%s1433_s26 + $0x1f4] sm:$0xf0]  ;;  %v1130_v38 = vld [vmem:[%s1433_s26 + $0x1f8] sm:$0xf0] }
  0x71   : > { %682 = vmatpush.bf16.msra.mxu0 %v945_v4  ;;  %695 = vmatpush.bf16.msra.mxu1 %v949_v5  ;;  %v1125_v41 = vor.u32 %v1195_v30, %v1122_v32  ;;  %v1129_v42 = vor.u32 %v1200_v34, %v1128_v33  ;;  %v1088_v43 = vld [vmem:[%s1433_s26 + $0x190] sm:$0xf]  ;;  %v1187_v45 = vld [vmem:[%s1433_s26 + $0x194] sm:$0xf]  ;;  %v1133_v46 = vor.u32 %v1196_v37, %v1130_v38  ;;  %v1096_v48 = vld [vmem:[%s1433_s26 + $0x198] sm:$0xf] }
  0x72   : > { %708 = vmatpush.bf16.msra.mxu2 %v953_v6  ;;  %v1191_v44 = vld [vmem:[%s1433_s26 + $0x1ac] sm:$0xf0]  ;;  %v1090_v47 = vld [vmem:[%s1433_s26 + $0x1b0] sm:$0xf0]  ;;  %v1192_v49 = vld [vmem:[%s1433_s26 + $0x1b4] sm:$0xf0] }
  0x73   : > { %721 = vmatpush.bf16.msra.mxu3 %v957_v10  ;;  %v1188_v50 = vld [vmem:[%s1433_s26 + $0x19c] sm:$0xf]  ;;  %v1518_v52 = vld [vmem:[%s1597_s0] sm:$0xf]  ;;  %v1089_v53 = vor.u32 %v1191_v44, %v1088_v43  ;;  %v1093_v54 = vor.u32 %v1187_v45, %v1090_v47  ;;  %v1097_v55 = vor.u32 %v1192_v49, %v1096_v48  ;;  %v1056_v56 = vld [vmem:[%s1433_s26 + $0x150] sm:$0xf] }
  0x74   : > { %v1098_v51 = vld [vmem:[%s1433_s26 + $0x1b8] sm:$0xf0]  ;;  %v1183_v57 = vld [vmem:[%s1433_s26 + $0x16c] sm:$0xf0]  ;;  %v1179_v58 = vld [vmem:[%s1433_s26 + $0x154] sm:$0xf] }
  0x75   : > { %683 = vmatpush.bf16.msra.mxu0 %v913_v16  ;;  %696 = vmatpush.bf16.msra.mxu1 %v917_v19  ;;  %v1101_v59 = vor.u32 %v1188_v50, %v1098_v51  ;;  %v1058_v60 = vld [vmem:[%s1433_s26 + $0x170] sm:$0xf0]  ;;  %v1064_v61 = vld [vmem:[%s1433_s26 + $0x158] sm:$0xf]  ;;  %v1180_v63 = vld [vmem:[%s1433_s26 + $0x15c] sm:$0xf]  ;;  %v1057_v1 = vor.u32 %v1183_v57, %v1056_v56 }
  0x76   : > { %709 = vmatpush.bf16.msra.mxu2 %v921_v20  ;;  %v1184_v62 = vld [vmem:[%s1433_s26 + $0x174] sm:$0xf0]  ;;  %v1066_v0 = vld [vmem:[%s1433_s26 + $0x178] sm:$0xf0]  ;;  %v1061_v2 = vor.u32 %v1179_v58, %v1058_v60  ;;  %v1024_v4 = vld [vmem:[%s1433_s26 + $0x110] sm:$0xf] }
  0x77   : > { %722 = vmatpush.bf16.msra.mxu3 %v925_v24  ;;  %v1065_v3 = vor.u32 %v1184_v62, %v1064_v61  ;;  %v1175_v5 = vld [vmem:[%s1433_s26 + $0x12c] sm:$0xf0]  ;;  %v1171_v6 = vld [vmem:[%s1433_s26 + $0x114] sm:$0xf]  ;;  %v1069_v7 = vor.u32 %v1180_v63, %v1066_v0  ;;  %v1032_v9 = vld [vmem:[%s1433_s26 + $0x118] sm:$0xf] }
  0x78   : > { %v1026_v8 = vld [vmem:[%s1433_s26 + $0x130] sm:$0xf0]  ;;  %v1176_v10 = vld [vmem:[%s1433_s26 + $0x134] sm:$0xf0]  ;;  %v1172_v11 = vld [vmem:[%s1433_s26 + $0x11c] sm:$0xf]  ;;  %v1025_v13 = vor.u32 %v1175_v5, %v1024_v4 }
  0x79   : > { %684 = vmatpush.bf16.msra.mxu0 %v881_v31  ;;  %697 = vmatpush.bf16.msra.mxu1 %v885_v35  ;;  %v1034_v12 = vld [vmem:[%s1433_s26 + $0x138] sm:$0xf0]  ;;  %v1029_v14 = vor.u32 %v1171_v6, %v1026_v8  ;;  %v1033_v15 = vor.u32 %v1176_v10, %v1032_v9  ;;  %v992_v16 = vld [vmem:[%s1433_s26 + $0xd0] sm:$0xf]  ;;  %v1163_v18 = vld [vmem:[%s1433_s26 + $0xd4] sm:$0xf] }
  0x7a   : > { %710 = vmatpush.bf16.msra.mxu2 %v889_v36  ;;  %v1167_v17 = vld [vmem:[%s1433_s26 + $0xec] sm:$0xf0]  ;;  %v1037_v19 = vor.u32 %v1172_v11, %v1034_v12  ;;  %v994_v20 = vld [vmem:[%s1433_s26 + $0xf0] sm:$0xf0]  ;;  %v1000_v21 = vld [vmem:[%s1433_s26 + $0xd8] sm:$0xf] }
  0x7b   : > { %723 = vmatpush.bf16.msra.mxu3 %v893_v39  ;;  %v1168_v22 = vld [vmem:[%s1433_s26 + $0xf4] sm:$0xf0]  ;;  %v1164_v23 = vld [vmem:[%s1433_s26 + $0xdc] sm:$0xf]  ;;  %v993_v25 = vor.u32 %v1167_v17, %v992_v16  ;;  %v997_v26 = vor.u32 %v1163_v18, %v994_v20  ;;  %v960_v28 = vld [vmem:[%s1433_s26 + $0x90] sm:$0xf] }
  0x7c   : > { %685 = vmatmul.bf16.vlgmr.msra.gmra.mxu0 %v1518_v52  ;;  %698 = vmatmul.bf16.vlgmr.msra.gmra.mxu1 %v1518_v52  ;;  %v1002_v24 = vld [vmem:[%s1433_s26 + $0xf8] sm:$0xf0]  ;;  %v1001_v27 = vor.u32 %v1168_v22, %v1000_v21  ;;  %v1159_v29 = vld [vmem:[%s1433_s26 + $0xac] sm:$0xf0]  ;;  %v1155_v30 = vld [vmem:[%s1433_s26 + $0x94] sm:$0xf] }
  0x7d   : > { %729 = vmatpush.bf16.msrb.mxu0 %v1121_v40  ;;  %742 = vmatpush.bf16.msrb.mxu1 %v1125_v41  ;;  %v1005_v31 = vor.u32 %v1164_v23, %v1002_v24  ;;  %v962_v32 = vld [vmem:[%s1433_s26 + $0xb0] sm:$0xf0]  ;;  %v968_v33 = vld [vmem:[%s1433_s26 + $0x98] sm:$0xf]  ;;  %v1156_v35 = vld [vmem:[%s1433_s26 + $0x9c] sm:$0xf]  ;;  %v961_v37 = vor.u32 %v1159_v29, %v960_v28 }
  0x7e   : > { %755 = vmatpush.bf16.msrb.mxu2 %v1129_v42  ;;  %724 = vmatmul.bf16.vlgmr.msra.gmra.mxu3 %v1518_v52  ;;  %v1160_v34 = vld [vmem:[%s1433_s26 + $0xb4] sm:$0xf0]  ;;  %v970_v36 = vld [vmem:[%s1433_s26 + $0xb8] sm:$0xf0]  ;;  %v965_v38 = vor.u32 %v1155_v30, %v962_v32  ;;  %v928_v40 = vld [vmem:[%s1433_s26 + $0x50] sm:$0xf] }
  0x7f   : > { %768 = vmatpush.bf16.msrb.mxu3 %v1133_v46  ;;  %711 = vmatmul.bf16.vlgmr.msra.gmra.mxu2 %v1518_v52  ;;  %v969_v39 = vor.u32 %v1160_v34, %v968_v33  ;;  %v1151_v41 = vld [vmem:[%s1433_s26 + $0x6c] sm:$0xf0]  ;;  %v1147_v42 = vld [vmem:[%s1433_s26 + $0x54] sm:$0xf]  ;;  %v973_v43 = vor.u32 %v1156_v35, %v970_v36  ;;  %v936_v45 = vld [vmem:[%s1433_s26 + $0x58] sm:$0xf] }
  0x80   : > { %v930_v44 = vld [vmem:[%s1433_s26 + $0x70] sm:$0xf0]  ;;  %v1152_v46 = vld [vmem:[%s1433_s26 + $0x74] sm:$0xf0]  ;;  %v1148_v47 = vld [vmem:[%s1433_s26 + $0x5c] sm:$0xf]  ;;  %v929_v49 = vor.u32 %v1151_v41, %v928_v40 }
  0x81   : > { %730 = vmatpush.bf16.msrb.mxu0 %v1089_v53  ;;  %743 = vmatpush.bf16.msrb.mxu1 %v1093_v54  ;;  %v938_v48 = vld [vmem:[%s1433_s26 + $0x78] sm:$0xf0]  ;;  %v933_v50 = vor.u32 %v1147_v42, %v930_v44  ;;  %v937_v51 = vor.u32 %v1152_v46, %v936_v45  ;;  %v896_v53 = vld [vmem:[%s1433_s26 + $0x10] sm:$0xf]  ;;  %v898_v57 = vld [vmem:[%s1433_s26 + $0x30] sm:$0xf0] }
  0x82   : > { %756 = vmatpush.bf16.msrb.mxu2 %v1097_v55  ;;  %v1143_v54 = vld [vmem:[%s1433_s26 + $0x2c] sm:$0xf0]  ;;  %v1139_v55 = vld [vmem:[%s1433_s26 + $0x14] sm:$0xf]  ;;  %v941_v56 = vor.u32 %v1148_v47, %v938_v48  ;;  %v904_v58 = vld [vmem:[%s1433_s26 + $0x18] sm:$0xf] }
  0x83   : > { %769 = vmatpush.bf16.msrb.mxu3 %v1101_v59  ;;  %v1144_v59 = vld [vmem:[%s1433_s26 + $0x34] sm:$0xf0]  ;;  %v1140_v60 = vld [vmem:[%s1433_s26 + $0x1c] sm:$0xf]  ;;  %v897_v62 = vor.u32 %v1143_v54, %v896_v53  ;;  %v901_v63 = vor.u32 %v1139_v55, %v898_v57  ;;  %s1604_s29 = smov (!%p287_p8, %s876_s29), 15 }
  0x84   : > { %v906_v61 = vld [vmem:[%s1433_s26 + $0x38] sm:$0xf0]  ;;  %v905_v0 = vor.u32 %v1144_v59, %v904_v58  ;;  %s877_s30 = sshll.u32 %s1604_s29, 2 }
  0x85   : > { %731 = vmatpush.bf16.msrb.mxu0 %v1057_v1  ;;  %744 = vmatpush.bf16.msrb.mxu1 %v1061_v2  ;;  %v909_v1 = vor.u32 %v1140_v60, %v906_v61  ;;  %s1581_s5 = scalar_lea.vmem %s1599_s2, %s877_s30 }
  0x86   : > { %757 = vmatpush.bf16.msrb.mxu2 %v1065_v3 }
  0x87   : > { %770 = vmatpush.bf16.msrb.mxu3 %v1069_v7 }
  0x89   : > { %732 = vmatpush.bf16.msrb.mxu0 %v1025_v13  ;;  %745 = vmatpush.bf16.msrb.mxu1 %v1029_v14 }
  0x8a   : > { %758 = vmatpush.bf16.msrb.mxu2 %v1033_v15 }
  0x8b   : > { %771 = vmatpush.bf16.msrb.mxu3 %v1037_v19 }
  0x8d   : > { %733 = vmatpush.bf16.msrb.mxu0 %v993_v25  ;;  %746 = vmatpush.bf16.msrb.mxu1 %v997_v26 }
  0x8e   : > { %759 = vmatpush.bf16.msrb.mxu2 %v1001_v27 }
  0x8f   : > { %772 = vmatpush.bf16.msrb.mxu3 %v1005_v31 }
  0x91   : > { %734 = vmatpush.bf16.msrb.mxu0 %v961_v37  ;;  %747 = vmatpush.bf16.msrb.mxu1 %v965_v38 }
  0x92   : > { %760 = vmatpush.bf16.msrb.mxu2 %v969_v39 }
  0x93   : > { %773 = vmatpush.bf16.msrb.mxu3 %v973_v43 }
  0x95   : > { %735 = vmatpush.bf16.msrb.mxu0 %v929_v49  ;;  %748 = vmatpush.bf16.msrb.mxu1 %v933_v50 }
  0x96   : > { %761 = vmatpush.bf16.msrb.mxu2 %v937_v51 }
  0x97   : > { %774 = vmatpush.bf16.msrb.mxu3 %v941_v56 }
  0x99   : > { %736 = vmatpush.bf16.msrb.mxu0 %v897_v62  ;;  %749 = vmatpush.bf16.msrb.mxu1 %v901_v63 }
  0x9a   : > { %762 = vmatpush.bf16.msrb.mxu2 %v905_v0 }
  0x9b   : > { %775 = vmatpush.bf16.msrb.mxu3 %v909_v1 }
  0x9c   : > { %737 = vmatmul.bf16.vlgmr.msrb.gmra.mxu0 %v1518_v52  ;;  %750 = vmatmul.bf16.vlgmr.msrb.gmra.mxu1 %v1518_v52 }
  0x9d   : > { %763 = vmatmul.bf16.vlgmr.msrb.gmra.mxu2 %v1518_v52 }
  0x9e   : > { %776 = vmatmul.bf16.vlgmr.msrb.gmra.mxu3 %v1518_v52 }
  0xf9   : > { %v686_v2 = vpop.f32.mrf.mxu0  ;;  %v699_v4 = vpop.f32.mrf.mxu1 }
  0xfa   : > { %v781_v3 = vmul.f32 0.2, %v686_v2  ;;  %v782_v5 = vmul.f32 0.2, %v699_v4 }
  0xfc   : > { %v789_v6 = vmax.f32 %v686_v2, %v781_v3  ;;  %v790_v7 = vmax.f32 %v699_v4, %v782_v5 }
  0xfe   : > { %v797_v52 = vpack.c.bf16 %v790_v7, %v789_v6 }
 0x100   : > { %801 = vst [vmem:[%s1581_s5] sm:$0xff] %v797_v52 }
 0x101   : > { %v725_v10 = vpop.f32.mrf.mxu3  ;;  %v688_v13 = vpop.f32.mrf.mxu0 }
 0x102   : > { %v712_v8 = vpop.f32.mrf.mxu2  ;;  %v784_v11 = vmul.f32 0.2, %v725_v10  ;;  %v701_v15 = vpop.f32.mrf.mxu1 }
 0x103   : > { %v783_v9 = vmul.f32 0.2, %v712_v8 }
 0x104   : > { %v792_v14 = vmax.f32 %v725_v10, %v784_v11 }
 0x105   : > { %v791_v12 = vmax.f32 %v712_v8, %v783_v9 }
 0x107   : > { %v798_v16 = vpack.c.bf16 %v792_v14, %v791_v12 }
 0x109   : > { %802 = vst [vmem:[%s1581_s5 + $0x8] sm:$0xff] %v798_v16  ;;  %v727_v18 = vpop.f32.mrf.mxu3 }
 0x10a   : > { %v714_v17 = vpop.f32.mrf.mxu2 }
 0x119   : > { %v738_v19 = vpop.f32.mrf.mxu0  ;;  %v751_v21 = vpop.f32.mrf.mxu1 }
 0x11a   : > { %v785_v20 = vmul.f32 0.2, %v738_v19  ;;  %v786_v22 = vmul.f32 0.2, %v751_v21 }
 0x11c   : > { %v793_v23 = vmax.f32 %v738_v19, %v785_v20  ;;  %v794_v24 = vmax.f32 %v751_v21, %v786_v22 }
 0x11e   : > { %v799_v25 = vpack.c.bf16 %v794_v24, %v793_v23 }
 0x120   : > { %v764_v26 = vpop.f32.mrf.mxu2  ;;  %803 = vst [vmem:[%s1581_s5 + $0x10] sm:$0xff] %v799_v25 }
 0x121   : > { %v787_v27 = vmul.f32 0.2, %v764_v26  ;;  %v777_v28 = vpop.f32.mrf.mxu3  ;;  %v740_v29 = vpop.f32.mrf.mxu0 }
 0x122   : > { %v788_v30 = vmul.f32 0.2, %v777_v28  ;;  %v753_v31 = vpop.f32.mrf.mxu1 }
 0x123   : > { %v795_v32 = vmax.f32 %v764_v26, %v787_v27 }
 0x124   : > { %v796_v33 = vmax.f32 %v777_v28, %v788_v30 }
 0x126   : > { %v800_v34 = vpack.c.bf16 %v796_v33, %v795_v32 }
 0x128   : > { %804 = vst [vmem:[%s1581_s5 + $0x18] sm:$0xff] %v800_v34  ;;  %v766_v35 = vpop.f32.mrf.mxu2 }
 0x129   : > { %v779_v36 = vpop.f32.mrf.mxu3 }
 0x12a PF: > { %p9_p9 = scmp.ge.s32.totalorder %s1281_s13, 4   ;;  %s1600_s9 = smov %s1243_s10 }
 0x12b   : > { %s1601_s10 = smov %s1290_s16  ;;  %s1602_s11 = smov %s1281_s13 }
 0x12c   :  { %11 = sbr.rel (!%p9_p9) target bundleno = 2 (0x2), region = 86 }

// kernel: netd_forward.6
= control target key start
LH: loop header
LB: loop body
LE: loop exit
PB: predicated region body
PF: predicated region fallthrough
CT: control target
= control target key end

     0   :  { %s896_s1 = inlined_call_operand.vmem [shape: bf16[128,512], index: 1, kind: input, shape index: {}]   ;;  %s897_s0 = inlined_call_operand.vmem [shape: bf16[16,128], index: 0, kind: input, shape index: {}]   ;;  %s898_s3 = inlined_call_operand.vmem [shape: f32[16,1], index: 3, kind: input, shape index: {}]   ;;  %s899_s2 = inlined_call_operand.vmem [shape: f32[16,1], index: 2, kind: input, shape index: {}]   ;;  %s900_s4 = inlined_call_operand.vmem [shape: bf16[16,512], index: 4, kind: output, shape index: {}]  }
   0x1   :  { %v556_v0 = vld [vmem:[%s896_s1 + $0xe0] sm:$0xf]  ;;  %v601_v1 = vld [vmem:[%s896_s1 + $0xec] sm:$0xf0]  ;;  %v599_v2 = vld [vmem:[%s896_s1 + $0xe4] sm:$0xf] }
   0x2   :  { %v557_v3 = vor.u32 %v601_v1, %v556_v0  ;;  %v558_v4 = vld [vmem:[%s896_s1 + $0xf0] sm:$0xf0]  ;;  %v564_v5 = vld [vmem:[%s896_s1 + $0xe8] sm:$0xf]  ;;  %v602_v6 = vld [vmem:[%s896_s1 + $0xf4] sm:$0xf0] }
   0x3   :  { %v561_v7 = vor.u32 %v599_v2, %v558_v4  ;;  %v565_v8 = vor.u32 %v602_v6, %v564_v5  ;;  %v600_v9 = vld [vmem:[%s896_s1 + $0xec] sm:$0xf]  ;;  %v566_v10 = vld [vmem:[%s896_s1 + $0xf8] sm:$0xf0]  ;;  %v540_v11 = vld [vmem:[%s896_s1 + $0xc0] sm:$0xf] }
   0x4   :  { %217 = vmatpush.bf16.msra.mxu0 %v557_v3  ;;  %v569_v12 = vor.u32 %v600_v9, %v566_v10  ;;  %v597_v13 = vld [vmem:[%s896_s1 + $0xcc] sm:$0xf0]  ;;  %v595_v14 = vld [vmem:[%s896_s1 + $0xc4] sm:$0xf]  ;;  %v542_v15 = vld [vmem:[%s896_s1 + $0xd0] sm:$0xf0] }
   0x5   :  { %231 = vmatpush.bf16.msra.mxu1 %v561_v7  ;;  %245 = vmatpush.bf16.msra.mxu2 %v565_v8  ;;  %v541_v16 = vor.u32 %v597_v13, %v540_v11  ;;  %v545_v17 = vor.u32 %v595_v14, %v542_v15  ;;  %v548_v18 = vld [vmem:[%s896_s1 + $0xc8] sm:$0xf]  ;;  %v598_v19 = vld [vmem:[%s896_s1 + $0xd4] sm:$0xf0]  ;;  %v596_v20 = vld [vmem:[%s896_s1 + $0xcc] sm:$0xf] }
   0x6   :  { %259 = vmatpush.bf16.msra.mxu3 %v569_v12  ;;  %v549_v21 = vor.u32 %v598_v19, %v548_v18  ;;  %v550_v22 = vld [vmem:[%s896_s1 + $0xd8] sm:$0xf0]  ;;  %v524_v23 = vld [vmem:[%s896_s1 + $0xa0] sm:$0xf]  ;;  %v593_v24 = vld [vmem:[%s896_s1 + $0xac] sm:$0xf0] }
   0x7   :  { %v553_v25 = vor.u32 %v596_v20, %v550_v22  ;;  %v591_v26 = vld [vmem:[%s896_s1 + $0xa4] sm:$0xf]  ;;  %v526_v27 = vld [vmem:[%s896_s1 + $0xb0] sm:$0xf0]  ;;  %v532_v28 = vld [vmem:[%s896_s1 + $0xa8] sm:$0xf]  ;;  %v525_v29 = vor.u32 %v593_v24, %v524_v23 }
   0x8   :  { %218 = vmatpush.bf16.msra.mxu0 %v541_v16  ;;  %v594_v30 = vld [vmem:[%s896_s1 + $0xb4] sm:$0xf0]  ;;  %v592_v31 = vld [vmem:[%s896_s1 + $0xac] sm:$0xf]  ;;  %v534_v32 = vld [vmem:[%s896_s1 + $0xb8] sm:$0xf0]  ;;  %v529_v33 = vor.u32 %v591_v26, %v526_v27 }
   0x9   :  { %232 = vmatpush.bf16.msra.mxu1 %v545_v17  ;;  %246 = vmatpush.bf16.msra.mxu2 %v549_v21  ;;  %v533_v34 = vor.u32 %v594_v30, %v532_v28  ;;  %v508_v35 = vld [vmem:[%s896_s1 + $0x80] sm:$0xf]  ;;  %v589_v36 = vld [vmem:[%s896_s1 + $0x8c] sm:$0xf0]  ;;  %v587_v37 = vld [vmem:[%s896_s1 + $0x84] sm:$0xf]  ;;  %v537_v38 = vor.u32 %v592_v31, %v534_v32 }
   0xa   :  { %260 = vmatpush.bf16.msra.mxu3 %v553_v25  ;;  %v510_v39 = vld [vmem:[%s896_s1 + $0x90] sm:$0xf0]  ;;  %v516_v40 = vld [vmem:[%s896_s1 + $0x88] sm:$0xf]  ;;  %v590_v41 = vld [vmem:[%s896_s1 + $0x94] sm:$0xf0]  ;;  %v509_v44 = vor.u32 %v589_v36, %v508_v35 }
   0xb   :  { %v588_v42 = vld [vmem:[%s896_s1 + $0x8c] sm:$0xf]  ;;  %v518_v43 = vld [vmem:[%s896_s1 + $0x98] sm:$0xf0]  ;;  %v513_v45 = vor.u32 %v587_v37, %v510_v39  ;;  %v517_v46 = vor.u32 %v590_v41, %v516_v40  ;;  %v492_v47 = vld [vmem:[%s896_s1 + $0x60] sm:$0xf] }
   0xc   :  { %219 = vmatpush.bf16.msra.mxu0 %v525_v29  ;;  %v585_v48 = vld [vmem:[%s896_s1 + $0x6c] sm:$0xf0]  ;;  %v583_v49 = vld [vmem:[%s896_s1 + $0x64] sm:$0xf]  ;;  %v521_v50 = vor.u32 %v588_v42, %v518_v43  ;;  %v494_v51 = vld [vmem:[%s896_s1 + $0x70] sm:$0xf0] }
   0xd   :  { %233 = vmatpush.bf16.msra.mxu1 %v529_v33  ;;  %247 = vmatpush.bf16.msra.mxu2 %v533_v34  ;;  %v500_v52 = vld [vmem:[%s896_s1 + $0x68] sm:$0xf]  ;;  %v586_v53 = vld [vmem:[%s896_s1 + $0x74] sm:$0xf0]  ;;  %v584_v54 = vld [vmem:[%s896_s1 + $0x6c] sm:$0xf]  ;;  %v493_v56 = vor.u32 %v585_v48, %v492_v47  ;;  %v497_v57 = vor.u32 %v583_v49, %v494_v51 }
   0xe   :  { %261 = vmatpush.bf16.msra.mxu3 %v537_v38  ;;  %v502_v55 = vld [vmem:[%s896_s1 + $0x78] sm:$0xf0]  ;;  %v501_v58 = vor.u32 %v586_v53, %v500_v52  ;;  %v476_v59 = vld [vmem:[%s896_s1 + $0x40] sm:$0xf]  ;;  %v581_v60 = vld [vmem:[%s896_s1 + $0x4c] sm:$0xf0] }
   0xf   :  { %v579_v61 = vld [vmem:[%s896_s1 + $0x44] sm:$0xf]  ;;  %v505_v62 = vor.u32 %v584_v54, %v502_v55  ;;  %v478_v63 = vld [vmem:[%s896_s1 + $0x50] sm:$0xf0]  ;;  %v484_v0 = vld [vmem:[%s896_s1 + $0x48] sm:$0xf]  ;;  %v477_v4 = vor.u32 %v581_v60, %v476_v59 }
  0x10   :  { %220 = vmatpush.bf16.msra.mxu0 %v509_v44  ;;  %v582_v1 = vld [vmem:[%s896_s1 + $0x54] sm:$0xf0]  ;;  %v580_v2 = vld [vmem:[%s896_s1 + $0x4c] sm:$0xf]  ;;  %v486_v3 = vld [vmem:[%s896_s1 + $0x58] sm:$0xf0]  ;;  %v481_v5 = vor.u32 %v579_v61, %v478_v63 }
  0x11   :  { %234 = vmatpush.bf16.msra.mxu1 %v513_v45  ;;  %248 = vmatpush.bf16.msra.mxu2 %v517_v46  ;;  %v485_v6 = vor.u32 %v582_v1, %v484_v0  ;;  %v460_v7 = vld [vmem:[%s896_s1 + $0x20] sm:$0xf]  ;;  %v577_v8 = vld [vmem:[%s896_s1 + $0x2c] sm:$0xf0]  ;;  %v575_v9 = vld [vmem:[%s896_s1 + $0x24] sm:$0xf]  ;;  %v489_v10 = vor.u32 %v580_v2, %v486_v3 }
  0x12   :  { %262 = vmatpush.bf16.msra.mxu3 %v521_v50  ;;  %v462_v11 = vld [vmem:[%s896_s1 + $0x30] sm:$0xf0]  ;;  %v468_v12 = vld [vmem:[%s896_s1 + $0x28] sm:$0xf]  ;;  %v578_v13 = vld [vmem:[%s896_s1 + $0x34] sm:$0xf0]  ;;  %v461_v16 = vor.u32 %v577_v8, %v460_v7 }
  0x13   :  { %v576_v14 = vld [vmem:[%s896_s1 + $0x2c] sm:$0xf]  ;;  %v470_v15 = vld [vmem:[%s896_s1 + $0x38] sm:$0xf0]  ;;  %v465_v17 = vor.u32 %v575_v9, %v462_v11  ;;  %v469_v18 = vor.u32 %v578_v13, %v468_v12  ;;  %v444_v19 = vld [vmem:[%s896_s1] sm:$0xf] }
  0x14   :  { %221 = vmatpush.bf16.msra.mxu0 %v493_v56  ;;  %v573_v20 = vld [vmem:[%s896_s1 + $0xc] sm:$0xf0]  ;;  %v571_v21 = vld [vmem:[%s896_s1 + $0x4] sm:$0xf]  ;;  %v473_v22 = vor.u32 %v576_v14, %v470_v15  ;;  %v446_v23 = vld [vmem:[%s896_s1 + $0x10] sm:$0xf0] }
  0x15   :  { %235 = vmatpush.bf16.msra.mxu1 %v497_v57  ;;  %249 = vmatpush.bf16.msra.mxu2 %v501_v58  ;;  %v452_v24 = vld [vmem:[%s896_s1 + $0x8] sm:$0xf]  ;;  %v574_v25 = vld [vmem:[%s896_s1 + $0x14] sm:$0xf0]  ;;  %v572_v26 = vld [vmem:[%s896_s1 + $0xc] sm:$0xf]  ;;  %v445_v28 = vor.u32 %v573_v20, %v444_v19  ;;  %v449_v29 = vor.u32 %v571_v21, %v446_v23 }
  0x16   :  { %263 = vmatpush.bf16.msra.mxu3 %v505_v62  ;;  %v454_v27 = vld [vmem:[%s896_s1 + $0x18] sm:$0xf0]  ;;  %v453_v30 = vor.u32 %v574_v25, %v452_v24  ;;  %v570_v32 = vld [vmem:[%s897_s0] sm:$0xff]  ;;  %v611_v9 = vmov 0   ;;  %v391_v11 = vld [vmem:[%s898_s3 + $0x8] sm:$0xff] }
  0x17   :  { %v457_v31 = vor.u32 %v572_v26, %v454_v27  ;;  %605 = vset.pattern.permute.xlu0 %v611_v9  ;;  %606 = vset.pattern.permute.xlu1 %v611_v9  ;;  %v346_v25 = vld [vmem:[%s899_s2] sm:$0xff] }
  0x18   :  { %222 = vmatpush.bf16.msra.mxu0 %v477_v4  ;;  %604 = vset.pattern.permute.xlu2 %v611_v9 }
  0x19   :  { %236 = vmatpush.bf16.msra.mxu1 %v481_v5  ;;  %250 = vmatpush.bf16.msra.mxu2 %v485_v6 }
  0x1a   :  { %264 = vmatpush.bf16.msra.mxu3 %v489_v10  ;;  %v390_v10 = vld [vmem:[%s898_s3] sm:$0xff] }
  0x1c   :  { %223 = vmatpush.bf16.msra.mxu0 %v461_v16 }
  0x1d   :  { %237 = vmatpush.bf16.msra.mxu1 %v465_v17  ;;  %251 = vmatpush.bf16.msra.mxu2 %v469_v18 }
  0x1e   :  { %265 = vmatpush.bf16.msra.mxu3 %v473_v22 }
  0x20   :  { %224 = vmatpush.bf16.msra.mxu0 %v445_v28 }
  0x21   :  { %238 = vmatpush.bf16.msra.mxu1 %v449_v29  ;;  %252 = vmatpush.bf16.msra.mxu2 %v453_v30 }
  0x22   :  { %266 = vmatpush.bf16.msra.mxu3 %v457_v31 }
  0x23   :  { %225 = vmatmul.bf16.vlgmr.msra.gmra.mxu0 %v570_v32 }
  0x24   :  { %239 = vmatmul.bf16.vlgmr.msra.gmra.mxu1 %v570_v32  ;;  %253 = vmatmul.bf16.vlgmr.msra.gmra.mxu2 %v570_v32 }
  0x25   :  { %267 = vmatmul.bf16.vlgmr.msra.gmra.mxu3 %v570_v32  ;;  %v347_v32 = vld [vmem:[%s899_s2 + $0x8] sm:$0xff] }
  0xa0   :  { %v226_v33 = vpop.f32.mrf.mxu0 }
  0xa1   :  { %v240_v34 = vpop.f32.mrf.mxu1 }
  0xa2   :  { %v298_v35 = vadd.f32 %v240_v34, %v226_v33 }
  0xa7   :  { %v254_v36 = vpop.f32.mrf.mxu2 }
  0xa8   :  { %v299_v37 = vadd.f32 %v298_v35, %v254_v36  ;;  %v268_v38 = vpop.f32.mrf.mxu3  ;;  %v228_v40 = vpop.f32.mrf.mxu0 }
  0xa9   :  { %v242_v41 = vpop.f32.mrf.mxu1 }
  0xaa   :  { %v300_v39 = vadd.f32 %v299_v37, %v268_v38  ;;  %v303_v42 = vadd.f32 %v242_v41, %v228_v40 }
  0xac   :  { %301 = vadd.xlane.f32.xlu0 %v300_v39 }
  0xaf   :  { %v256_v43 = vpop.f32.mrf.mxu2 }
  0xb0   :  { %v304_v44 = vadd.f32 %v303_v42, %v256_v43  ;;  %v270_v45 = vpop.f32.mrf.mxu3 }
  0xb2   :  { %v305_v46 = vadd.f32 %v304_v44, %v270_v45 }
  0xb4   :  { %306 = vadd.xlane.f32.xlu0 %v305_v46 }
  0xc8   :  { %394 = vperm.xlu0 %605, %v390_v10  }
 0x11f   :  { %v302_v47 = vpop.xlane.xlu0 %301 }
 0x120   :  { %v308_v48 = vmul.f32 0.001953125, %v302_v47 }
 0x122   :  { %v832_v49 = vsub.f32 %v226_v33, %v308_v48  ;;  %v834_v50 = vsub.f32 %v240_v34, %v308_v48  ;;  %v836_v51 = vsub.f32 %v254_v36, %v308_v48  ;;  %v838_v52 = vsub.f32 %v268_v38, %v308_v48 }
 0x124   :  { %v326_v53 = vmul.f32 %v832_v49, %v832_v49  ;;  %v327_v54 = vmul.f32 %v834_v50, %v834_v50  ;;  %v328_v55 = vmul.f32 %v836_v51, %v836_v51  ;;  %v329_v59 = vmul.f32 %v838_v52, %v838_v52 }
 0x126   :  { %v334_v56 = vadd.f32 %v327_v54, %v326_v53 }
 0x127   :  { %v307_v57 = vpop.xlane.xlu0 %306 }
 0x128   :  { %v309_v58 = vmul.f32 0.001953125, %v307_v57  ;;  %v335_v60 = vadd.f32 %v334_v56, %v328_v55 }
 0x12a   :  { %v848_v61 = vsub.f32 %v228_v40, %v309_v58  ;;  %v850_v62 = vsub.f32 %v242_v41, %v309_v58  ;;  %v336_v63 = vadd.f32 %v335_v60, %v329_v59  ;;  %v852_v0 = vsub.f32 %v256_v43, %v309_v58 }
 0x12b   :  { %v854_v1 = vsub.f32 %v270_v45, %v309_v58 }
 0x12c   :  { %337 = vadd.xlane.f32.xlu1 %v336_v63  ;;  %v330_v2 = vmul.f32 %v848_v61, %v848_v61  ;;  %v331_v3 = vmul.f32 %v850_v62, %v850_v62  ;;  %v332_v4 = vmul.f32 %v852_v0, %v852_v0 }
 0x12d   :  { %v333_v6 = vmul.f32 %v854_v1, %v854_v1 }
 0x12e   :  { %v339_v5 = vadd.f32 %v331_v3, %v330_v2 }
 0x130   :  { %v340_v7 = vadd.f32 %v339_v5, %v332_v4 }
 0x132   :  { %v341_v8 = vadd.f32 %v340_v7, %v333_v6 }
 0x134   :  { %342 = vadd.xlane.f32.xlu1 %v341_v8 }
 0x13a   :  { %v395_v37 = vpop.permute.xlu0 %394 }
 0x14d   :  { %399 = vperm.xlu1 %606, %v391_v11  }
 0x19f   :  { %v338_v12 = vpop.xlane.xlu1 %337 }
 0x1a0   :  { %v344_v13 = vmul.f32 0.001953125, %v338_v12 }
 0x1a2   :  { %v348_v14 = vadd.f32 1e-05, %v344_v13 }
 0x1a4   :  { %607 = vrsqrt.f32 %v348_v14  ;;  %vm356_vm1 = vweird.f32 %v348_v14 }
 0x1a7   :  { %v343_v15 = vpop.xlane.xlu1 %342 }
 0x1a8   :  { %v345_v16 = vmul.f32 0.001953125, %v343_v15 }
 0x1aa   :  { %v608_v17 = vpop.eup %607  ;;  %v349_v18 = vadd.f32 1e-05, %v345_v16 }
 0x1ab   :  { %v351_v19 = vmul.f32 %v608_v17, %v348_v14  ;;  %vm357_vm0 = vweird.f32 %v608_v17 }
 0x1ac   :  { %609 = vrsqrt.f32 %v349_v18  ;;  %vm358_vm2 = vmor %vm356_vm1, %vm357_vm0  ;;  %vm366_vm4 = vweird.f32 %v349_v18 }
 0x1ad   :  { %v352_v20 = vmul.f32 %v608_v17, %v351_v19 }
 0x1af   :  { %v353_v21 = vmul.f32 0.5, %v352_v20 }
 0x1b1   :  { %v354_v22 = vsub.f32 1.5, %v353_v21 }
 0x1b2   :  { %v610_v23 = vpop.eup %609 }
 0x1b3   :  { %v361_v24 = vmul.f32 %v610_v23, %v349_v18  ;;  %v355_v26 = vmul.f32 %v608_v17, %v354_v22  ;;  %vm367_vm3 = vweird.f32 %v610_v23 }
 0x1b4   :  { %vm368_vm5 = vmor %vm366_vm4, %vm367_vm3 }
 0x1b5   :  { %v362_v27 = vmul.f32 %v610_v23, %v361_v24  ;;  %v359_v28 = vsel %vm358_vm2, %v608_v17, %v355_v26 }
 0x1b6   :  { %v370_v29 = vmul.f32 %v359_v28, %v346_v25 }
 0x1b7   :  { %v363_v30 = vmul.f32 0.5, %v362_v27 }
 0x1b8   :  { %374 = vperm.xlu2 %604, %v370_v29  }
 0x1b9   :  { %v364_v31 = vsub.f32 1.5, %v363_v30 }
 0x1bb   :  { %v365_v33 = vmul.f32 %v610_v23, %v364_v31 }
 0x1bd   :  { %v369_v34 = vsel %vm368_vm5, %v610_v23, %v365_v33 }
 0x1be   :  { %v371_v35 = vmul.f32 %v369_v34, %v347_v32 }
 0x1c0   :  { %379 = vperm.xlu2 %604, %v371_v35  }
 0x212   :  { %v375_v36 = vpop.permute.xlu2 %374 }
 0x213   :  { %v382_v38 = vmul.f32 %v375_v36, %v832_v49  ;;  %v383_v39 = vmul.f32 %v375_v36, %v834_v50  ;;  %v384_v40 = vmul.f32 %v375_v36, %v836_v51  ;;  %v385_v41 = vmul.f32 %v375_v36, %v838_v52  ;;  %v400_v49 = vpop.permute.xlu1 %399 }
 0x215   :  { %v402_v42 = vadd.f32 %v395_v37, %v382_v38  ;;  %v403_v43 = vadd.f32 %v395_v37, %v383_v39  ;;  %v404_v44 = vadd.f32 %v395_v37, %v384_v40  ;;  %v405_v45 = vadd.f32 %v395_v37, %v385_v41 }
 0x217   :  { %v410_v46 = vmul.f32 0.2, %v402_v42  ;;  %v411_v47 = vmul.f32 0.2, %v403_v43  ;;  %v412_v48 = vmul.f32 0.2, %v404_v44 }
 0x218   :  { %v413_v53 = vmul.f32 0.2, %v405_v45 }
 0x219   :  { %v418_v54 = vmax.f32 %v402_v42, %v410_v46  ;;  %v419_v55 = vmax.f32 %v403_v43, %v411_v47  ;;  %v420_v56 = vmax.f32 %v404_v44, %v412_v48 }
 0x21a   :  { %v421_v57 = vmax.f32 %v405_v45, %v413_v53  ;;  %v380_v58 = vpop.permute.xlu2 %379 }
 0x21b   :  { %v426_v59 = vpack.c.bf16 %v419_v55, %v418_v54  ;;  %v386_v50 = vmul.f32 %v380_v58, %v848_v61  ;;  %v387_v51 = vmul.f32 %v380_v58, %v850_v62  ;;  %v388_v52 = vmul.f32 %v380_v58, %v852_v0 }
 0x21c   :  { %v427_v60 = vpack.c.bf16 %v421_v57, %v420_v56  ;;  %v389_v63 = vmul.f32 %v380_v58, %v854_v1 }
 0x21d   :  { %430 = vst [vmem:[%s900_s4] sm:$0xff] %v426_v59  ;;  %v406_v2 = vadd.f32 %v400_v49, %v386_v50  ;;  %v407_v3 = vadd.f32 %v400_v49, %v387_v51  ;;  %v408_v4 = vadd.f32 %v400_v49, %v388_v52 }
 0x21e   :  { %431 = vst [vmem:[%s900_s4 + $0x8] sm:$0xff] %v427_v60  ;;  %v409_v5 = vadd.f32 %v400_v49, %v389_v63 }
 0x21f   :  { %v414_v61 = vmul.f32 0.2, %v406_v2  ;;  %v415_v6 = vmul.f32 0.2, %v407_v3  ;;  %v416_v62 = vmul.f32 0.2, %v408_v4 }
 0x220   :  { %v417_v7 = vmul.f32 0.2, %v409_v5 }
 0x221   :  { %v422_v0 = vmax.f32 %v406_v2, %v414_v61  ;;  %v423_v8 = vmax.f32 %v407_v3, %v415_v6  ;;  %v424_v9 = vmax.f32 %v408_v4, %v416_v62 }
 0x222   :  { %v425_v1 = vmax.f32 %v409_v5, %v417_v7 }
 0x223   :  { %v428_v10 = vpack.c.bf16 %v423_v8, %v422_v0 }
 0x224   :  { %v429_v11 = vpack.c.bf16 %v425_v1, %v424_v9 }
 0x225   :  { %432 = vst [vmem:[%s900_s4 + $0x10] sm:$0xff] %v428_v10 }
 0x226   :  { %433 = vst [vmem:[%s900_s4 + $0x18] sm:$0xff] %v429_v11 }

// kernel: netd_forward.7
= control target key start
LH: loop header
LB: loop body
LE: loop exit
PB: predicated region body
PF: predicated region fallthrough
CT: control target
= control target key end

     0   :  { %v515_v56 = vmov 0   ;;  %s663_s1 = inlined_call_operand.vmem [shape: bf16[256,128], index: 1, kind: input, shape index: {}]   ;;  %s664_s0 = inlined_call_operand.vmem [shape: bf16[32,256], index: 0, kind: input, shape index: {}]   ;;  %s665_s2 = inlined_call_operand.vmem [shape: f32[32,1], index: 2, kind: input, shape index: {}]   ;;  %s666_s3 = inlined_call_operand.vmem [shape: f32[32,1], index: 3, kind: input, shape index: {}]   ;;  %s667_s4 = inlined_call_operand.vmem [shape: bf16[32,128], index: 4, kind: output, shape index: {}]  }
   0x1   :  { %v467_v0 = vld [vmem:[%s663_s1 + $0x38] sm:$0xff]  ;;  %v466_v2 = vld [vmem:[%s663_s1 + $0x30] sm:$0xff]  ;;  %v465_v4 = vld [vmem:[%s663_s1 + $0x28] sm:$0xff]  ;;  %504 = vset.pattern.permute.xlu2 %v515_v56  ;;  %506 = vset.pattern.permute.xlu1 %v515_v56 }
   0x2   :  { %v475_v1 = vld [vmem:[%s663_s1 + $0x78] sm:$0xff]  ;;  %169 = vmatpush.bf16.msra.mxu0 %v467_v0  ;;  %487 = vmatpush.bf16.msra.mxu2 %v467_v0  ;;  %v474_v3 = vld [vmem:[%s663_s1 + $0x70] sm:$0xff]  ;;  %v473_v5 = vld [vmem:[%s663_s1 + $0x68] sm:$0xff] }
   0x3   :  { %188 = vmatpush.bf16.msra.mxu1 %v475_v1  ;;  %495 = vmatpush.bf16.msra.mxu3 %v475_v1  ;;  %v464_v6 = vld [vmem:[%s663_s1 + $0x20] sm:$0xff]  ;;  %v463_v8 = vld [vmem:[%s663_s1 + $0x18] sm:$0xff]  ;;  %v462_v10 = vld [vmem:[%s663_s1 + $0x10] sm:$0xff] }
   0x4   :  { %v472_v7 = vld [vmem:[%s663_s1 + $0x60] sm:$0xff]  ;;  %v471_v9 = vld [vmem:[%s663_s1 + $0x58] sm:$0xff]  ;;  %v470_v11 = vld [vmem:[%s663_s1 + $0x50] sm:$0xff]  ;;  %505 = vset.pattern.permute.xlu0 %v515_v56 }
   0x5   :  { %v461_v12 = vld [vmem:[%s663_s1 + $0x8] sm:$0xff]  ;;  %v460_v14 = vld [vmem:[%s663_s1] sm:$0xff]  ;;  %v386_v18 = vld [vmem:[%s664_s0 + $0x10] sm:$0xf] }
   0x6   :  { %170 = vmatpush.bf16.msra.mxu0 %v466_v2  ;;  %488 = vmatpush.bf16.msra.mxu2 %v466_v2  ;;  %v469_v13 = vld [vmem:[%s663_s1 + $0x48] sm:$0xff]  ;;  %v468_v15 = vld [vmem:[%s663_s1 + $0x40] sm:$0xff]  ;;  %v459_v19 = vld [vmem:[%s664_s0 + $0x14] sm:$0xf0] }
   0x7   :  { %189 = vmatpush.bf16.msra.mxu1 %v474_v3  ;;  %496 = vmatpush.bf16.msra.mxu3 %v474_v3  ;;  %v378_v16 = vld [vmem:[%s664_s0] sm:$0xf]  ;;  %v457_v17 = vld [vmem:[%s664_s0 + $0x4] sm:$0xf0]  ;;  %v456_v20 = vld [vmem:[%s664_s0 + $0x4] sm:$0xf]  ;;  %v387_v25 = vor.u32 %v459_v19, %v386_v18 }
   0x8   :  { %v380_v21 = vld [vmem:[%s664_s0 + $0x8] sm:$0xf0]  ;;  %v458_v22 = vld [vmem:[%s664_s0 + $0x14] sm:$0xf]  ;;  %v388_v23 = vld [vmem:[%s664_s0 + $0x18] sm:$0xf0]  ;;  %v379_v24 = vor.u32 %v457_v17, %v378_v16 }
   0x9   :  { %v383_v26 = vor.u32 %v456_v20, %v380_v21  ;;  %v391_v27 = vor.u32 %v458_v22, %v388_v23 }
   0xa   :  { %171 = vmatpush.bf16.msra.mxu0 %v465_v4  ;;  %489 = vmatpush.bf16.msra.mxu2 %v465_v4 }
   0xb   :  { %190 = vmatpush.bf16.msra.mxu1 %v473_v5  ;;  %497 = vmatpush.bf16.msra.mxu3 %v473_v5 }
   0xe   :  { %172 = vmatpush.bf16.msra.mxu0 %v464_v6  ;;  %490 = vmatpush.bf16.msra.mxu2 %v464_v6 }
   0xf   :  { %191 = vmatpush.bf16.msra.mxu1 %v472_v7  ;;  %498 = vmatpush.bf16.msra.mxu3 %v472_v7 }
  0x12   :  { %173 = vmatpush.bf16.msra.mxu0 %v463_v8  ;;  %491 = vmatpush.bf16.msra.mxu2 %v463_v8 }
  0x13   :  { %192 = vmatpush.bf16.msra.mxu1 %v471_v9  ;;  %499 = vmatpush.bf16.msra.mxu3 %v471_v9 }
  0x16   :  { %174 = vmatpush.bf16.msra.mxu0 %v462_v10  ;;  %492 = vmatpush.bf16.msra.mxu2 %v462_v10 }
  0x17   :  { %193 = vmatpush.bf16.msra.mxu1 %v470_v11  ;;  %500 = vmatpush.bf16.msra.mxu3 %v470_v11 }
  0x1a   :  { %175 = vmatpush.bf16.msra.mxu0 %v461_v12  ;;  %493 = vmatpush.bf16.msra.mxu2 %v461_v12 }
  0x1b   :  { %194 = vmatpush.bf16.msra.mxu1 %v469_v13  ;;  %501 = vmatpush.bf16.msra.mxu3 %v469_v13 }
  0x1e   :  { %176 = vmatpush.bf16.msra.mxu0 %v460_v14  ;;  %494 = vmatpush.bf16.msra.mxu2 %v460_v14 }
  0x1f   :  { %195 = vmatpush.bf16.msra.mxu1 %v468_v15  ;;  %502 = vmatpush.bf16.msra.mxu3 %v468_v15  ;;  %v252_v15 = vld [vmem:[%s665_s2] sm:$0xff] }
  0x21   :  { %177 = vmatmul.bf16.vlgmr.msra.gmra.mxu0 %v379_v24  ;;  %182 = vmatmul.bf16.vlgmr.msra.gmra.mxu2 %v387_v25 }
  0x22   :  { %196 = vmatmul.bf16.vlgmr.msra.gmra.mxu1 %v383_v26  ;;  %201 = vmatmul.bf16.vlgmr.msra.gmra.mxu3 %v391_v27  ;;  %v254_v26 = vld [vmem:[%s665_s2 + $0x10] sm:$0xff] }
  0x9e   :  { %v178_v28 = vpop.f32.mrf.mxu0 }
  0x9f   :  { %v197_v29 = vpop.f32.mrf.mxu1 }
  0xa0   :  { %v198_v30 = vadd.f32 %v197_v29, %v178_v28 }
  0xa2   :  { %216 = vadd.xlane.f32.xlu0 %v198_v30 }
  0xa4   :  { %v183_v31 = vpop.f32.mrf.mxu2 }
  0xa5   :  { %v202_v32 = vpop.f32.mrf.mxu3 }
  0xa6   :  { %v203_v33 = vadd.f32 %v202_v32, %v183_v31  ;;  %v180_v34 = vpop.f32.mrf.mxu0 }
  0xa7   :  { %v199_v35 = vpop.f32.mrf.mxu1 }
  0xa8   :  { %v200_v36 = vadd.f32 %v199_v35, %v180_v34  ;;  %220 = vadd.xlane.f32.xlu1 %v203_v33  ;;  %v328_v34 = vld [vmem:[%s666_s3] sm:$0xff] }
  0xaa   :  { %218 = vadd.xlane.f32.xlu0 %v200_v36 }
  0xac   :  { %v185_v37 = vpop.f32.mrf.mxu2 }
  0xad   :  { %v204_v38 = vpop.f32.mrf.mxu3 }
  0xae   :  { %v205_v39 = vadd.f32 %v204_v38, %v185_v37 }
  0xb0   :  { %222 = vadd.xlane.f32.xlu1 %v205_v39 }
 0x115   :  { %v217_v40 = vpop.xlane.xlu0 %216 }
 0x116   :  { %v224_v41 = vmul.f32 0.0078125, %v217_v40  ;;  %v255_v40 = vld [vmem:[%s665_s2 + $0x18] sm:$0xff] }
 0x118   :  { %v613_v42 = vsub.f32 %v198_v30, %v224_v41  ;;  %v253_v30 = vld [vmem:[%s665_s2 + $0x8] sm:$0xff] }
 0x11a   :  { %v236_v43 = vmul.f32 %v613_v42, %v613_v42 }
 0x11b   :  { %v221_v44 = vpop.xlane.xlu1 %220 }
 0x11c   :  { %v226_v45 = vmul.f32 0.0078125, %v221_v44  ;;  %240 = vadd.xlane.f32.xlu2 %v236_v43  ;;  %v331_v44 = vld [vmem:[%s666_s3 + $0x18] sm:$0xff] }
 0x11d   :  { %v219_v46 = vpop.xlane.xlu0 %218 }
 0x11e   :  { %v617_v47 = vsub.f32 %v203_v33, %v226_v45  ;;  %v225_v48 = vmul.f32 0.0078125, %v219_v46  ;;  %v330_v45 = vld [vmem:[%s666_s3 + $0x10] sm:$0xff] }
 0x120   :  { %v619_v49 = vsub.f32 %v200_v36, %v225_v48  ;;  %v238_v50 = vmul.f32 %v617_v47, %v617_v47 }
 0x122   :  { %244 = vadd.xlane.f32.xlu0 %v238_v50  ;;  %v237_v51 = vmul.f32 %v619_v49, %v619_v49 }
 0x123   :  { %v223_v52 = vpop.xlane.xlu1 %222 }
 0x124   :  { %v227_v53 = vmul.f32 0.0078125, %v223_v52  ;;  %242 = vadd.xlane.f32.xlu2 %v237_v51 }
 0x126   :  { %v625_v54 = vsub.f32 %v205_v39, %v227_v53  ;;  %v329_v39 = vld [vmem:[%s666_s3 + $0x8] sm:$0xff] }
 0x128   :  { %v239_v55 = vmul.f32 %v625_v54, %v625_v54 }
 0x12a   :  { %246 = vadd.xlane.f32.xlu1 %v239_v55 }
 0x18f   :  { %v241_v57 = vpop.xlane.xlu2 %240 }
 0x190   :  { %v248_v58 = vmul.f32 0.0078125, %v241_v57 }
 0x192   :  { %v256_v59 = vadd.f32 1e-05, %v248_v58 }
 0x194   :  { %507 = vrsqrt.f32 %v256_v59  ;;  %vm266_vm1 = vweird.f32 %v256_v59 }
 0x195   :  { %v245_v60 = vpop.xlane.xlu0 %244 }
 0x196   :  { %v250_v61 = vmul.f32 0.0078125, %v245_v60 }
 0x197   :  { %v243_v62 = vpop.xlane.xlu2 %242 }
 0x198   :  { %v258_v63 = vadd.f32 1e-05, %v250_v61  ;;  %v249_v0 = vmul.f32 0.0078125, %v243_v62 }
 0x19a   :  { %v508_v1 = vpop.eup %507  ;;  %509 = vrsqrt.f32 %v258_v63  ;;  %v257_v2 = vadd.f32 1e-05, %v249_v0  ;;  %vm286_vm4 = vweird.f32 %v258_v63 }
 0x19b   :  { %v261_v3 = vmul.f32 %v508_v1, %v256_v59  ;;  %vm267_vm0 = vweird.f32 %v508_v1 }
 0x19c   :  { %511 = vrsqrt.f32 %v257_v2  ;;  %vm268_vm2 = vmor %vm266_vm1, %vm267_vm0  ;;  %vm276_vm7 = vweird.f32 %v257_v2 }
 0x19d   :  { %v262_v4 = vmul.f32 %v508_v1, %v261_v3  ;;  %v247_v5 = vpop.xlane.xlu1 %246 }
 0x19e   :  { %v251_v6 = vmul.f32 0.0078125, %v247_v5 }
 0x19f   :  { %v263_v7 = vmul.f32 0.5, %v262_v4 }
 0x1a0   :  { %v510_v8 = vpop.eup %509  ;;  %v259_v9 = vadd.f32 1e-05, %v251_v6 }
 0x1a1   :  { %v264_v10 = vsub.f32 1.5, %v263_v7  ;;  %v281_v11 = vmul.f32 %v510_v8, %v258_v63  ;;  %vm287_vm3 = vweird.f32 %v510_v8 }
 0x1a2   :  { %v512_v12 = vpop.eup %511  ;;  %513 = vrsqrt.f32 %v259_v9  ;;  %vm288_vm6 = vmor %vm286_vm4, %vm287_vm3  ;;  %vm296_vm10 = vweird.f32 %v259_v9 }
 0x1a3   :  { %v282_v13 = vmul.f32 %v510_v8, %v281_v11  ;;  %v271_v14 = vmul.f32 %v512_v12, %v257_v2  ;;  %v265_v16 = vmul.f32 %v508_v1, %v264_v10  ;;  %vm277_vm5 = vweird.f32 %v512_v12 }
 0x1a4   :  { %vm278_vm8 = vmor %vm276_vm7, %vm277_vm5 }
 0x1a5   :  { %v283_v17 = vmul.f32 0.5, %v282_v13  ;;  %v272_v18 = vmul.f32 %v512_v12, %v271_v14  ;;  %v269_v19 = vsel %vm268_vm2, %v508_v1, %v265_v16 }
 0x1a6   :  { %v300_v20 = vmul.f32 %v269_v19, %v252_v15 }
 0x1a7   :  { %v284_v21 = vsub.f32 1.5, %v283_v17  ;;  %v273_v22 = vmul.f32 0.5, %v272_v18 }
 0x1a8   :  { %v514_v23 = vpop.eup %513  ;;  %306 = vperm.xlu2 %504, %v300_v20  }
 0x1a9   :  { %v274_v24 = vsub.f32 1.5, %v273_v22  ;;  %v291_v25 = vmul.f32 %v514_v23, %v259_v9  ;;  %v285_v27 = vmul.f32 %v510_v8, %v284_v21  ;;  %vm297_vm9 = vweird.f32 %v514_v23 }
 0x1aa   :  { %vm298_vm11 = vmor %vm296_vm10, %vm297_vm9 }
 0x1ab   :  { %v292_v28 = vmul.f32 %v514_v23, %v291_v25  ;;  %v289_v29 = vsel %vm288_vm6, %v510_v8, %v285_v27  ;;  %v275_v31 = vmul.f32 %v512_v12, %v274_v24 }
 0x1ac   :  { %v302_v32 = vmul.f32 %v289_v29, %v254_v26 }
 0x1ad   :  { %v293_v33 = vmul.f32 0.5, %v292_v28  ;;  %v279_v35 = vsel %vm278_vm8, %v512_v12, %v275_v31 }
 0x1ae   :  { %316 = vperm.xlu1 %506, %v302_v32   ;;  %v301_v36 = vmul.f32 %v279_v35, %v253_v30 }
 0x1af   :  { %v294_v37 = vsub.f32 1.5, %v293_v33 }
 0x1b0   :  { %334 = vperm.xlu2 %504, %v328_v34   ;;  %311 = vperm.xlu0 %505, %v301_v36  }
 0x1b1   :  { %v295_v38 = vmul.f32 %v514_v23, %v294_v37 }
 0x1b3   :  { %v299_v41 = vsel %vm298_vm11, %v514_v23, %v295_v38 }
 0x1b4   :  { %v303_v43 = vmul.f32 %v299_v41, %v255_v40 }
 0x1b6   :  { %339 = vperm.xlu1 %506, %v329_v39  }
 0x1b8   :  { %321 = vperm.xlu2 %504, %v303_v43  }
 0x1be   :  { %349 = vperm.xlu1 %506, %v331_v44  }
 0x1c0   :  { %344 = vperm.xlu2 %504, %v330_v45  }
 0x202   :  { %v307_v46 = vpop.permute.xlu2 %306 }
 0x203   :  { %v324_v52 = vmul.f32 %v307_v46, %v613_v42 }
 0x20a   :  { %v335_v48 = vpop.permute.xlu2 %334 }
 0x20b   :  { %v352_v55 = vadd.f32 %v335_v48, %v324_v52 }
 0x20d   :  { %v356_v58 = vmul.f32 0.2, %v352_v55 }
 0x20f   :  { %v360_v63 = vmax.f32 %v352_v55, %v356_v58 }
 0x212   :  { %v322_v51 = vpop.permute.xlu2 %321 }
 0x213   :  { %v327_v2 = vmul.f32 %v322_v51, %v625_v54 }
 0x21a   :  { %v345_v62 = vpop.permute.xlu2 %344 }
 0x220   :  { %v317_v50 = vpop.permute.xlu1 %316 }
 0x221   :  { %v326_v59 = vmul.f32 %v317_v50, %v617_v47 }
 0x222   :  { %v312_v53 = vpop.permute.xlu0 %311 }
 0x223   :  { %v325_v56 = vmul.f32 %v312_v53, %v619_v49  ;;  %v354_v0 = vadd.f32 %v345_v62, %v326_v59 }
 0x225   :  { %v358_v5 = vmul.f32 0.2, %v354_v0 }
 0x227   :  { %v362_v6 = vmax.f32 %v354_v0, %v358_v5 }
 0x228   :  { %v340_v57 = vpop.permute.xlu1 %339 }
 0x229   :  { %v353_v60 = vadd.f32 %v340_v57, %v325_v56 }
 0x22b   :  { %v357_v61 = vmul.f32 0.2, %v353_v60 }
 0x22d   :  { %v361_v1 = vmax.f32 %v353_v60, %v357_v61 }
 0x22f   :  { %v479_v3 = vpack.c.bf16 %v361_v1, %v360_v63 }
 0x230   :  { %v350_v4 = vpop.permute.xlu1 %349 }
 0x231   :  { %480 = vst [vmem:[%s667_s4] sm:$0xff] %v479_v3   ;;  %v355_v42 = vadd.f32 %v350_v4, %v327_v2 }
 0x233   :  { %v359_v49 = vmul.f32 0.2, %v355_v42 }
 0x235   :  { %v363_v7 = vmax.f32 %v355_v42, %v359_v49 }
 0x237   :  { %v484_v47 = vpack.c.bf16 %v363_v7, %v362_v6 }
 0x239   :  { %486 = vst [vmem:[%s667_s4 + $0x8] sm:$0xff] %v484_v47  }

// kernel: netd_forward.8
= control target key start
LH: loop header
LB: loop body
LE: loop exit
PB: predicated region body
PF: predicated region fallthrough
CT: control target
= control target key end

     0   :  { %s1455_s1 = inlined_call_operand.vmem [shape: bf16[512,128], index: 1, kind: input, shape index: {}]   ;;  %s1456_s0 = inlined_call_operand.vmem [shape: bf16[64,512], index: 0, kind: input, shape index: {}]   ;;  %s1457_s3 = inlined_call_operand.vmem [shape: f32[64,1], index: 3, kind: input, shape index: {}]   ;;  %s1458_s2 = inlined_call_operand.vmem [shape: f32[64,1], index: 2, kind: input, shape index: {}]   ;;  %s1459_s4 = inlined_call_operand.vmem [shape: bf16[64,128], index: 4, kind: output, shape index: {}]  }
   0x1   :  { %v1030_v0 = vld [vmem:[%s1455_s1 + $0x38] sm:$0xff]  ;;  %v1029_v4 = vld [vmem:[%s1455_s1 + $0x30] sm:$0xff]  ;;  %v1028_v8 = vld [vmem:[%s1455_s1 + $0x28] sm:$0xff] }
   0x2   :  { %v1038_v1 = vld [vmem:[%s1455_s1 + $0x78] sm:$0xff]  ;;  %369 = vmatpush.bf16.msra.mxu0 %v1030_v0  ;;  %v1037_v5 = vld [vmem:[%s1455_s1 + $0x70] sm:$0xff]  ;;  %v1036_v9 = vld [vmem:[%s1455_s1 + $0x68] sm:$0xff] }
   0x3   :  { %v1046_v2 = vld [vmem:[%s1455_s1 + $0xb8] sm:$0xff]  ;;  %398 = vmatpush.bf16.msra.mxu1 %v1038_v1  ;;  %v1045_v6 = vld [vmem:[%s1455_s1 + $0xb0] sm:$0xff]  ;;  %v1044_v10 = vld [vmem:[%s1455_s1 + $0xa8] sm:$0xff] }
   0x4   :  { %v1054_v3 = vld [vmem:[%s1455_s1 + $0xf8] sm:$0xff]  ;;  %427 = vmatpush.bf16.msra.mxu2 %v1046_v2  ;;  %v1053_v7 = vld [vmem:[%s1455_s1 + $0xf0] sm:$0xff]  ;;  %v1052_v11 = vld [vmem:[%s1455_s1 + $0xe8] sm:$0xff] }
   0x5   :  { %456 = vmatpush.bf16.msra.mxu3 %v1054_v3  ;;  %v1027_v12 = vld [vmem:[%s1455_s1 + $0x20] sm:$0xff]  ;;  %v1026_v16 = vld [vmem:[%s1455_s1 + $0x18] sm:$0xff]  ;;  %v1025_v20 = vld [vmem:[%s1455_s1 + $0x10] sm:$0xff] }
   0x6   :  { %370 = vmatpush.bf16.msra.mxu0 %v1029_v4  ;;  %v1035_v13 = vld [vmem:[%s1455_s1 + $0x60] sm:$0xff]  ;;  %v1034_v17 = vld [vmem:[%s1455_s1 + $0x58] sm:$0xff]  ;;  %v1033_v21 = vld [vmem:[%s1455_s1 + $0x50] sm:$0xff] }
   0x7   :  { %399 = vmatpush.bf16.msra.mxu1 %v1037_v5  ;;  %v1043_v14 = vld [vmem:[%s1455_s1 + $0xa0] sm:$0xff]  ;;  %v1042_v18 = vld [vmem:[%s1455_s1 + $0x98] sm:$0xff]  ;;  %v1041_v22 = vld [vmem:[%s1455_s1 + $0x90] sm:$0xff] }
   0x8   :  { %428 = vmatpush.bf16.msra.mxu2 %v1045_v6  ;;  %v1051_v15 = vld [vmem:[%s1455_s1 + $0xe0] sm:$0xff]  ;;  %v1050_v19 = vld [vmem:[%s1455_s1 + $0xd8] sm:$0xff]  ;;  %v1049_v23 = vld [vmem:[%s1455_s1 + $0xd0] sm:$0xff] }
   0x9   :  { %457 = vmatpush.bf16.msra.mxu3 %v1053_v7  ;;  %v1024_v24 = vld [vmem:[%s1455_s1 + $0x8] sm:$0xff]  ;;  %v1023_v28 = vld [vmem:[%s1455_s1] sm:$0xff]  ;;  %v1009_v33 = vld [vmem:[%s1456_s0 + $0xc] sm:$0xf0] }
   0xa   :  { %371 = vmatpush.bf16.msra.mxu0 %v1028_v8  ;;  %v1032_v25 = vld [vmem:[%s1455_s1 + $0x48] sm:$0xff]  ;;  %v1031_v29 = vld [vmem:[%s1455_s1 + $0x40] sm:$0xff]  ;;  %v818_v35 = vld [vmem:[%s1456_s0 + $0x10] sm:$0xf0] }
   0xb   :  { %400 = vmatpush.bf16.msra.mxu1 %v1036_v9  ;;  %v1040_v26 = vld [vmem:[%s1455_s1 + $0x88] sm:$0xff]  ;;  %v1039_v30 = vld [vmem:[%s1455_s1 + $0x80] sm:$0xff]  ;;  %v1010_v37 = vld [vmem:[%s1456_s0 + $0x14] sm:$0xf0] }
   0xc   :  { %429 = vmatpush.bf16.msra.mxu2 %v1044_v10  ;;  %v1048_v27 = vld [vmem:[%s1455_s1 + $0xc8] sm:$0xff]  ;;  %v1047_v31 = vld [vmem:[%s1455_s1 + $0xc0] sm:$0xff]  ;;  %v826_v39 = vld [vmem:[%s1456_s0 + $0x18] sm:$0xf0] }
   0xd   :  { %458 = vmatpush.bf16.msra.mxu3 %v1052_v11  ;;  %v816_v32 = vld [vmem:[%s1456_s0] sm:$0xf]  ;;  %v1007_v34 = vld [vmem:[%s1456_s0 + $0x4] sm:$0xf]  ;;  %v824_v36 = vld [vmem:[%s1456_s0 + $0x8] sm:$0xf] }
   0xe   :  { %372 = vmatpush.bf16.msra.mxu0 %v1027_v12  ;;  %v1008_v38 = vld [vmem:[%s1456_s0 + $0xc] sm:$0xf]  ;;  %v817_v40 = vor.u32 %v1009_v33, %v816_v32  ;;  %v821_v41 = vor.u32 %v1007_v34, %v818_v35  ;;  %v825_v42 = vor.u32 %v1010_v37, %v824_v36  ;;  %v832_v44 = vld [vmem:[%s1456_s0 + $0x20] sm:$0xf]  ;;  %v1013_v45 = vld [vmem:[%s1456_s0 + $0x2c] sm:$0xf0] }
   0xf   :  { %401 = vmatpush.bf16.msra.mxu1 %v1035_v13  ;;  %v829_v43 = vor.u32 %v1008_v38, %v826_v39  ;;  %v1011_v46 = vld [vmem:[%s1456_s0 + $0x24] sm:$0xf]  ;;  %v834_v47 = vld [vmem:[%s1456_s0 + $0x30] sm:$0xf0]  ;;  %v840_v48 = vld [vmem:[%s1456_s0 + $0x28] sm:$0xf]  ;;  %v833_v52 = vor.u32 %v1013_v45, %v832_v44 }
  0x10   :  { %430 = vmatpush.bf16.msra.mxu2 %v1043_v14  ;;  %v1014_v49 = vld [vmem:[%s1456_s0 + $0x34] sm:$0xf0]  ;;  %v1012_v50 = vld [vmem:[%s1456_s0 + $0x2c] sm:$0xf]  ;;  %v842_v51 = vld [vmem:[%s1456_s0 + $0x38] sm:$0xf0]  ;;  %v837_v53 = vor.u32 %v1011_v46, %v834_v47 }
  0x11   :  { %459 = vmatpush.bf16.msra.mxu3 %v1051_v15  ;;  %v841_v54 = vor.u32 %v1014_v49, %v840_v48  ;;  %v845_v55 = vor.u32 %v1012_v50, %v842_v51  ;;  %v848_v56 = vld [vmem:[%s1456_s0 + $0x40] sm:$0xf]  ;;  %v1017_v57 = vld [vmem:[%s1456_s0 + $0x4c] sm:$0xf0]  ;;  %v1015_v58 = vld [vmem:[%s1456_s0 + $0x44] sm:$0xf] }
  0x12   :  { %373 = vmatpush.bf16.msra.mxu0 %v1026_v16  ;;  %v850_v59 = vld [vmem:[%s1456_s0 + $0x50] sm:$0xf0]  ;;  %v856_v60 = vld [vmem:[%s1456_s0 + $0x48] sm:$0xf]  ;;  %v1018_v61 = vld [vmem:[%s1456_s0 + $0x54] sm:$0xf0]  ;;  %v849_v0 = vor.u32 %v1017_v57, %v848_v56  ;;  %v485_v16 = vlaneseq }
  0x13   :  { %402 = vmatpush.bf16.msra.mxu1 %v1034_v17  ;;  %v1016_v62 = vld [vmem:[%s1456_s0 + $0x4c] sm:$0xf]  ;;  %v858_v63 = vld [vmem:[%s1456_s0 + $0x58] sm:$0xf0]  ;;  %v853_v1 = vor.u32 %v1015_v58, %v850_v59  ;;  %v857_v2 = vor.u32 %v1018_v61, %v856_v60  ;;  %v864_v4 = vld [vmem:[%s1456_s0 + $0x60] sm:$0xf] }
  0x14   :  { %431 = vmatpush.bf16.msra.mxu2 %v1042_v18  ;;  %v861_v3 = vor.u32 %v1016_v62, %v858_v63  ;;  %v1021_v5 = vld [vmem:[%s1456_s0 + $0x6c] sm:$0xf0]  ;;  %v1019_v6 = vld [vmem:[%s1456_s0 + $0x64] sm:$0xf]  ;;  %v866_v7 = vld [vmem:[%s1456_s0 + $0x70] sm:$0xf0] }
  0x15   :  { %460 = vmatpush.bf16.msra.mxu3 %v1050_v19  ;;  %v872_v8 = vld [vmem:[%s1456_s0 + $0x68] sm:$0xf]  ;;  %v1022_v9 = vld [vmem:[%s1456_s0 + $0x74] sm:$0xf0]  ;;  %v1020_v10 = vld [vmem:[%s1456_s0 + $0x6c] sm:$0xf]  ;;  %v865_v12 = vor.u32 %v1021_v5, %v864_v4  ;;  %v869_v13 = vor.u32 %v1019_v6, %v866_v7 }
  0x16   :  { %374 = vmatpush.bf16.msra.mxu0 %v1025_v20  ;;  %v874_v11 = vld [vmem:[%s1456_s0 + $0x78] sm:$0xf0]  ;;  %v873_v14 = vor.u32 %v1022_v9, %v872_v8  ;;  %v486_v19 = vand.u32 127, %v485_v16  ;;  %v1100_v57 = vmov 0  }
  0x17   :  { %403 = vmatpush.bf16.msra.mxu1 %v1033_v21  ;;  %v877_v15 = vor.u32 %v1020_v10, %v874_v11  ;;  %1080 = vset.pattern.permute.xlu1 %v1100_v57 }
  0x18   :  { %432 = vmatpush.bf16.msra.mxu2 %v1041_v22  ;;  %vm487_vm0 = vcmp.lt.s32.totalorder %v486_v19, 32  ;;  %1081 = vset.pattern.permute.xlu0 %v1100_v57 }
  0x19   :  { %461 = vmatpush.bf16.msra.mxu3 %v1049_v23  ;;  %1082 = vset.pattern.permute.xlu2 %v1100_v57 }
  0x1a   :  { %375 = vmatpush.bf16.msra.mxu0 %v1024_v24 }
  0x1b   :  { %404 = vmatpush.bf16.msra.mxu1 %v1032_v25 }
  0x1c   :  { %433 = vmatpush.bf16.msra.mxu2 %v1040_v26  ;;  %v1099_v26 = vmov 0.0  }
  0x1d   :  { %462 = vmatpush.bf16.msra.mxu3 %v1048_v27  ;;  %v1318_v27 = vsel %vm487_vm0, 1.0, %v1099_v26 }
  0x1e   :  { %376 = vmatpush.bf16.msra.mxu0 %v1023_v28 }
  0x1f   :  { %405 = vmatpush.bf16.msra.mxu1 %v1031_v29 }
  0x20   :  { %434 = vmatpush.bf16.msra.mxu2 %v1039_v30 }
  0x21   :  { %463 = vmatpush.bf16.msra.mxu3 %v1047_v31  ;;  %377 = vmatmul.bf16.vlgmr.msra.gmra.mxu0 %v817_v40 }
  0x22   :  { %406 = vmatmul.bf16.vlgmr.msra.gmra.mxu1 %v821_v41 }
  0x23   :  { %435 = vmatmul.bf16.vlgmr.msra.gmra.mxu2 %v825_v42 }
  0x24   :  { %464 = vmatmul.bf16.vlgmr.msra.gmra.mxu3 %v829_v43 }
  0x31   :  { %382 = vmatmul.bf16.gmra.mxu0 %v833_v52 }
  0x32   :  { %411 = vmatmul.bf16.gmra.mxu1 %v837_v53 }
  0x33   :  { %440 = vmatmul.bf16.gmra.mxu2 %v841_v54 }
  0x34   :  { %469 = vmatmul.bf16.gmra.mxu3 %v845_v55 }
  0x41   :  { %387 = vmatmul.bf16.gmra.mxu0 %v849_v0 }
  0x42   :  { %416 = vmatmul.bf16.gmra.mxu1 %v853_v1 }
  0x43   :  { %445 = vmatmul.bf16.gmra.mxu2 %v857_v2 }
  0x44   :  { %474 = vmatmul.bf16.gmra.mxu3 %v861_v3 }
  0x51   :  { %392 = vmatmul.bf16.gmra.mxu0 %v865_v12 }
  0x52   :  { %421 = vmatmul.bf16.gmra.mxu1 %v869_v13 }
  0x53   :  { %450 = vmatmul.bf16.gmra.mxu2 %v873_v14 }
  0x54   :  { %479 = vmatmul.bf16.gmra.mxu3 %v877_v15 }
  0x9e   :  { %v378_v17 = vpop.f32.mrf.mxu0 }
  0x9f   :  { %v407_v18 = vpop.f32.mrf.mxu1 }
  0xa0   :  { %v408_v20 = vadd.f32 %v407_v18, %v378_v17 }
  0xa6   :  { %v436_v21 = vpop.f32.mrf.mxu2  ;;  %v380_v24 = vpop.f32.mrf.mxu0 }
  0xa7   :  { %v465_v22 = vpop.f32.mrf.mxu3  ;;  %v437_v23 = vadd.f32 %v436_v21, %v408_v20  ;;  %v409_v25 = vpop.f32.mrf.mxu1  ;;  %v722_v21 = vld [vmem:[%s1457_s3] sm:$0xff] }
  0xa8   :  { %v410_v30 = vadd.f32 %v409_v25, %v380_v24 }
  0xa9   :  { %v1320_v28 = vadd.f32 %v465_v22, %v437_v23 }
  0xab   :  { %v490_v29 = vmul.f32 %v1318_v27, %v1320_v28 }
  0xad   :  { %498 = vadd.xlane.f32.xlu0 %v490_v29 }
  0xae   :  { %v438_v31 = vpop.f32.mrf.mxu2  ;;  %v383_v34 = vpop.f32.mrf.mxu0 }
  0xaf   :  { %v467_v32 = vpop.f32.mrf.mxu3  ;;  %v439_v33 = vadd.f32 %v438_v31, %v410_v30  ;;  %v412_v35 = vpop.f32.mrf.mxu1 }
  0xb0   :  { %v413_v37 = vadd.f32 %v412_v35, %v383_v34 }
  0xb1   :  { %v1324_v36 = vadd.f32 %v467_v32, %v439_v33 }
  0xb3   :  { %v491_v38 = vmul.f32 %v1318_v27, %v1324_v36 }
  0xb5   :  { %500 = vadd.xlane.f32.xlu0 %v491_v38 }
  0xb6   :  { %v441_v39 = vpop.f32.mrf.mxu2  ;;  %v385_v42 = vpop.f32.mrf.mxu0 }
  0xb7   :  { %v470_v40 = vpop.f32.mrf.mxu3  ;;  %v442_v41 = vadd.f32 %v441_v39, %v413_v37  ;;  %v414_v43 = vpop.f32.mrf.mxu1 }
  0xb8   :  { %v415_v46 = vadd.f32 %v414_v43, %v385_v42 }
  0xb9   :  { %v1328_v44 = vadd.f32 %v470_v40, %v442_v41 }
  0xbb   :  { %v492_v45 = vmul.f32 %v1318_v27, %v1328_v44 }
  0xbd   :  { %502 = vadd.xlane.f32.xlu1 %v492_v45 }
  0xbe   :  { %v443_v47 = vpop.f32.mrf.mxu2  ;;  %v388_v50 = vpop.f32.mrf.mxu0 }
  0xbf   :  { %v472_v48 = vpop.f32.mrf.mxu3  ;;  %v444_v49 = vadd.f32 %v443_v47, %v415_v46  ;;  %v417_v51 = vpop.f32.mrf.mxu1 }
  0xc0   :  { %v418_v53 = vadd.f32 %v417_v51, %v388_v50 }
  0xc1   :  { %v1332_v52 = vadd.f32 %v472_v48, %v444_v49 }
  0xc3   :  { %v493_v54 = vmul.f32 %v1318_v27, %v1332_v52 }
  0xc5   :  { %504 = vadd.xlane.f32.xlu1 %v493_v54 }
  0xc6   :  { %v446_v55 = vpop.f32.mrf.mxu2  ;;  %v390_v59 = vpop.f32.mrf.mxu0 }
  0xc7   :  { %v475_v56 = vpop.f32.mrf.mxu3  ;;  %v447_v58 = vadd.f32 %v446_v55, %v418_v53  ;;  %v419_v60 = vpop.f32.mrf.mxu1 }
  0xc8   :  { %v420_v63 = vadd.f32 %v419_v60, %v390_v59 }
  0xc9   :  { %v476_v61 = vadd.f32 %v475_v56, %v447_v58 }
  0xcb   :  { %v494_v62 = vmul.f32 %v1318_v27, %v476_v61 }
  0xcd   :  { %506 = vadd.xlane.f32.xlu2 %v494_v62 }
  0xce   :  { %v448_v0 = vpop.f32.mrf.mxu2  ;;  %v393_v3 = vpop.f32.mrf.mxu0 }
  0xcf   :  { %v477_v1 = vpop.f32.mrf.mxu3  ;;  %v449_v2 = vadd.f32 %v448_v0, %v420_v63  ;;  %v422_v4 = vpop.f32.mrf.mxu1  ;;  %v725_v63 = vld [vmem:[%s1457_s3 + $0x18] sm:$0xff]  ;;  %v723_v0 = vld [vmem:[%s1457_s3 + $0x8] sm:$0xff] }
  0xd0   :  { %v423_v6 = vadd.f32 %v422_v4, %v393_v3 }
  0xd1   :  { %v478_v5 = vadd.f32 %v477_v1, %v449_v2  ;;  %v724_v1 = vld [vmem:[%s1457_s3 + $0x10] sm:$0xff]  ;;  %v726_v2 = vld [vmem:[%s1457_s3 + $0x20] sm:$0xff] }
  0xd3   :  { %v495_v7 = vmul.f32 %v1318_v27, %v478_v5 }
  0xd5   :  { %508 = vadd.xlane.f32.xlu2 %v495_v7 }
  0xd6   :  { %v451_v8 = vpop.f32.mrf.mxu2  ;;  %v395_v12 = vpop.f32.mrf.mxu0 }
  0xd7   :  { %v480_v9 = vpop.f32.mrf.mxu3  ;;  %v452_v10 = vadd.f32 %v451_v8, %v423_v6  ;;  %v424_v13 = vpop.f32.mrf.mxu1 }
  0xd8   :  { %v425_v15 = vadd.f32 %v424_v13, %v395_v12 }
  0xd9   :  { %v481_v11 = vadd.f32 %v480_v9, %v452_v10 }
  0xdb   :  { %v496_v14 = vmul.f32 %v1318_v27, %v481_v11 }
  0xdd   :  { %510 = vadd.xlane.f32.xlu0 %v496_v14 }
  0xde   :  { %v453_v16 = vpop.f32.mrf.mxu2 }
  0xdf   :  { %v454_v17 = vadd.f32 %v453_v16, %v425_v15  ;;  %v482_v18 = vpop.f32.mrf.mxu3 }
  0xe1   :  { %v483_v19 = vadd.f32 %v482_v18, %v454_v17 }
  0xe3   :  { %v497_v20 = vmul.f32 %v1318_v27, %v483_v19 }
  0xe5   :  { %512 = vadd.xlane.f32.xlu1 %v497_v20 }
  0xfe   :  { %732 = vperm.xlu1 %1080, %v722_v21  }
 0x120   :  { %v499_v22 = vpop.xlane.xlu0 %498 }
 0x121   :  { %v514_v23 = vmul.f32 0.03125, %v499_v22 }
 0x123   :  { %v522_v24 = vsub.f32 %v1320_v28, %v514_v23 }
 0x125   :  { %v1345_v25 = vmul.f32 %v1318_v27, %v522_v24 }
 0x127   :  { %v538_v26 = vmul.f32 %v1345_v25, %v1345_v25 }
 0x128   :  { %v501_v29 = vpop.xlane.xlu0 %500 }
 0x129   :  { %v515_v30 = vmul.f32 0.03125, %v501_v29  ;;  %546 = vadd.xlane.f32.xlu2 %v538_v26 }
 0x12b   :  { %v523_v31 = vsub.f32 %v1324_v36, %v515_v30 }
 0x12d   :  { %v1351_v32 = vmul.f32 %v1318_v27, %v523_v31 }
 0x12f   :  { %v539_v33 = vmul.f32 %v1351_v32, %v1351_v32 }
 0x130   :  { %v503_v34 = vpop.xlane.xlu1 %502 }
 0x131   :  { %v516_v35 = vmul.f32 0.03125, %v503_v34  ;;  %548 = vadd.xlane.f32.xlu0 %v539_v33 }
 0x133   :  { %v524_v28 = vsub.f32 %v1328_v44, %v516_v35  ;;  %v571_v35 = vld [vmem:[%s1458_s2 + $0x8] sm:$0xff] }
 0x135   :  { %v1357_v37 = vmul.f32 %v1318_v27, %v524_v28 }
 0x137   :  { %v540_v38 = vmul.f32 %v1357_v37, %v1357_v37 }
 0x138   :  { %v505_v39 = vpop.xlane.xlu1 %504 }
 0x139   :  { %v517_v40 = vmul.f32 0.03125, %v505_v39  ;;  %550 = vadd.xlane.f32.xlu1 %v540_v38 }
 0x13b   :  { %v525_v36 = vsub.f32 %v1332_v52, %v517_v40 }
 0x13d   :  { %v1363_v41 = vmul.f32 %v1318_v27, %v525_v36 }
 0x13f   :  { %v541_v42 = vmul.f32 %v1363_v41, %v1363_v41 }
 0x140   :  { %v507_v43 = vpop.xlane.xlu2 %506 }
 0x141   :  { %v518_v45 = vmul.f32 0.03125, %v507_v43  ;;  %552 = vadd.xlane.f32.xlu2 %v541_v42 }
 0x143   :  { %v526_v44 = vsub.f32 %v476_v61, %v518_v45 }
 0x145   :  { %v1368_v46 = vmul.f32 %v1318_v27, %v526_v44 }
 0x147   :  { %v542_v47 = vmul.f32 %v1368_v46, %v1368_v46 }
 0x148   :  { %v509_v48 = vpop.xlane.xlu2 %508 }
 0x149   :  { %v519_v49 = vmul.f32 0.03125, %v509_v48  ;;  %554 = vadd.xlane.f32.xlu0 %v542_v47 }
 0x14b   :  { %v527_v50 = vsub.f32 %v478_v5, %v519_v49  ;;  %v572_v49 = vld [vmem:[%s1458_s2 + $0x10] sm:$0xff] }
 0x14d   :  { %v1373_v51 = vmul.f32 %v1318_v27, %v527_v50 }
 0x14f   :  { %v543_v52 = vmul.f32 %v1373_v51, %v1373_v51 }
 0x150   :  { %v511_v53 = vpop.xlane.xlu0 %510 }
 0x151   :  { %v520_v54 = vmul.f32 0.03125, %v511_v53  ;;  %556 = vadd.xlane.f32.xlu1 %v543_v52 }
 0x153   :  { %v528_v55 = vsub.f32 %v481_v11, %v520_v54 }
 0x155   :  { %v1378_v56 = vmul.f32 %v1318_v27, %v528_v55 }
 0x157   :  { %v544_v57 = vmul.f32 %v1378_v56, %v1378_v56 }
 0x158   :  { %v513_v58 = vpop.xlane.xlu1 %512 }
 0x159   :  { %v521_v59 = vmul.f32 0.03125, %v513_v58  ;;  %558 = vadd.xlane.f32.xlu2 %v544_v57 }
 0x15b   :  { %v529_v60 = vsub.f32 %v483_v19, %v521_v59  ;;  %v570_v19 = vld [vmem:[%s1458_s2] sm:$0xff] }
 0x15d   :  { %v1383_v61 = vmul.f32 %v1318_v27, %v529_v60 }
 0x15f   :  { %v545_v62 = vmul.f32 %v1383_v61, %v1383_v61 }
 0x161   :  { %560 = vadd.xlane.f32.xlu0 %v545_v62 }
 0x16a   :  { %747 = vperm.xlu1 %1080, %v725_v63  }
 0x170   :  { %v1399_v5 = vpop.permute.xlu1 %732 }
 0x171   :  { %742 = vperm.xlu2 %1082, %v724_v1  }
 0x175   :  { %737 = vperm.xlu0 %1081, %v723_v0   ;;  %v573_v0 = vld [vmem:[%s1458_s2 + $0x18] sm:$0xff] }
 0x17d   :  { %752 = vperm.xlu0 %1081, %v726_v2  }
 0x19c   :  { %v547_v27 = vpop.xlane.xlu2 %546 }
 0x19d   :  { %v562_v3 = vmul.f32 0.03125, %v547_v27 }
 0x19f   :  { %v578_v4 = vadd.f32 1e-05, %v562_v3  ;;  %v729_v3 = vld [vmem:[%s1457_s3 + $0x38] sm:$0xff] }
 0x1a1   :  { %1083 = vrsqrt.f32 %v578_v4  ;;  %vm592_vm2 = vweird.f32 %v578_v4 }
 0x1a4   :  { %v549_v6 = vpop.xlane.xlu0 %548 }
 0x1a5   :  { %v563_v7 = vmul.f32 0.03125, %v549_v6 }
 0x1a7   :  { %v1084_v8 = vpop.eup %1083  ;;  %v579_v9 = vadd.f32 1e-05, %v563_v7 }
 0x1a8   :  { %v587_v10 = vmul.f32 %v1084_v8, %v578_v4  ;;  %vm593_vm1 = vweird.f32 %v1084_v8 }
 0x1a9   :  { %1085 = vrsqrt.f32 %v579_v9  ;;  %vm594_vm3 = vmor %vm592_vm2, %vm593_vm1  ;;  %vm602_vm5 = vweird.f32 %v579_v9 }
 0x1aa   :  { %v588_v11 = vmul.f32 %v1084_v8, %v587_v10 }
 0x1ac   :  { %v589_v12 = vmul.f32 0.5, %v588_v11  ;;  %v551_v13 = vpop.xlane.xlu1 %550 }
 0x1ad   :  { %v564_v14 = vmul.f32 0.03125, %v551_v13  ;;  %v574_v13 = vld [vmem:[%s1458_s2 + $0x20] sm:$0xff] }
 0x1ae   :  { %v590_v15 = vsub.f32 1.5, %v589_v12 }
 0x1af   :  { %v1086_v16 = vpop.eup %1085  ;;  %v580_v17 = vadd.f32 1e-05, %v564_v14 }
 0x1b0   :  { %v597_v18 = vmul.f32 %v1086_v16, %v579_v9  ;;  %v591_v20 = vmul.f32 %v1084_v8, %v590_v15  ;;  %vm603_vm4 = vweird.f32 %v1086_v16 }
 0x1b1   :  { %1087 = vrsqrt.f32 %v580_v17  ;;  %vm604_vm6 = vmor %vm602_vm5, %vm603_vm4  ;;  %vm612_vm8 = vweird.f32 %v580_v17 }
 0x1b2   :  { %v598_v21 = vmul.f32 %v1086_v16, %v597_v18  ;;  %v595_v22 = vsel %vm594_vm3, %v1084_v8, %v591_v20 }
 0x1b3   :  { %v666_v23 = vmul.f32 %v595_v22, %v570_v19 }
 0x1b4   :  { %v599_v24 = vmul.f32 0.5, %v598_v21  ;;  %v553_v26 = vpop.xlane.xlu2 %552 }
 0x1b5   :  { %v565_v29 = vmul.f32 0.03125, %v553_v26  ;;  %676 = vperm.xlu1 %1080, %v666_v23   ;;  %v575_v26 = vld [vmem:[%s1458_s2 + $0x28] sm:$0xff] }
 0x1b6   :  { %v600_v30 = vsub.f32 1.5, %v599_v24 }
 0x1b7   :  { %v1088_v31 = vpop.eup %1087  ;;  %v581_v33 = vadd.f32 1e-05, %v565_v29 }
 0x1b8   :  { %v607_v34 = vmul.f32 %v1088_v31, %v580_v17  ;;  %v601_v28 = vmul.f32 %v1086_v16, %v600_v30  ;;  %vm613_vm7 = vweird.f32 %v1088_v31 }
 0x1b9   :  { %1089 = vrsqrt.f32 %v581_v33  ;;  %vm614_vm9 = vmor %vm612_vm8, %vm613_vm7  ;;  %vm622_vm11 = vweird.f32 %v581_v33 }
 0x1ba   :  { %v608_v38 = vmul.f32 %v1088_v31, %v607_v34  ;;  %v605_v39 = vsel %vm604_vm6, %v1086_v16, %v601_v28 }
 0x1bb   :  { %v667_v40 = vmul.f32 %v605_v39, %v571_v35  ;;  %v576_v39 = vld [vmem:[%s1458_s2 + $0x30] sm:$0xff] }
 0x1bc   :  { %v609_v36 = vmul.f32 0.5, %v608_v38  ;;  %v555_v42 = vpop.xlane.xlu0 %554 }
 0x1bd   :  { %v566_v43 = vmul.f32 0.03125, %v555_v42  ;;  %681 = vperm.xlu2 %1082, %v667_v40  }
 0x1be   :  { %v610_v45 = vsub.f32 1.5, %v609_v36 }
 0x1bf   :  { %v1090_v44 = vpop.eup %1089  ;;  %v582_v47 = vadd.f32 1e-05, %v566_v43 }
 0x1c0   :  { %v617_v48 = vmul.f32 %v1090_v44, %v581_v33  ;;  %v611_v50 = vmul.f32 %v1088_v31, %v610_v45  ;;  %vm623_vm10 = vweird.f32 %v1090_v44 }
 0x1c1   :  { %1091 = vrsqrt.f32 %v582_v47  ;;  %vm624_vm12 = vmor %vm622_vm11, %vm623_vm10  ;;  %vm632_vm14 = vweird.f32 %v582_v47 }
 0x1c2   :  { %v618_v52 = vmul.f32 %v1090_v44, %v617_v48  ;;  %v615_v53 = vsel %vm614_vm9, %v1088_v31, %v611_v50 }
 0x1c3   :  { %v668_v54 = vmul.f32 %v615_v53, %v572_v49  ;;  %v728_v49 = vld [vmem:[%s1457_s3 + $0x30] sm:$0xff]  ;;  %v727_v53 = vld [vmem:[%s1457_s3 + $0x28] sm:$0xff] }
 0x1c4   :  { %v619_v55 = vmul.f32 0.5, %v618_v52  ;;  %v557_v57 = vpop.xlane.xlu1 %556 }
 0x1c5   :  { %v567_v58 = vmul.f32 0.03125, %v557_v57  ;;  %686 = vperm.xlu0 %1081, %v668_v54  }
 0x1c6   :  { %v620_v59 = vsub.f32 1.5, %v619_v55 }
 0x1c7   :  { %v1092_v60 = vpop.eup %1091  ;;  %v583_v62 = vadd.f32 1e-05, %v567_v58 }
 0x1c8   :  { %v627_v63 = vmul.f32 %v1092_v60, %v582_v47  ;;  %v621_v1 = vmul.f32 %v1090_v44, %v620_v59  ;;  %vm633_vm13 = vweird.f32 %v1092_v60  ;;  %v577_v47 = vld [vmem:[%s1458_s2 + $0x38] sm:$0xff] }
 0x1c9   :  { %1093 = vrsqrt.f32 %v583_v62  ;;  %vm634_vm15 = vmor %vm632_vm14, %vm633_vm13  ;;  %vm642_vm1 = vweird.f32 %v583_v62 }
 0x1ca   :  { %v628_v27 = vmul.f32 %v1092_v60, %v627_v63  ;;  %v625_v2 = vsel %vm624_vm12, %v1090_v44, %v621_v1 }
 0x1cb   :  { %v669_v4 = vmul.f32 %v625_v2, %v573_v0 }
 0x1cc   :  { %v629_v6 = vmul.f32 0.5, %v628_v27  ;;  %v559_v7 = vpop.xlane.xlu2 %558 }
 0x1cd   :  { %v568_v8 = vmul.f32 0.03125, %v559_v7  ;;  %691 = vperm.xlu2 %1082, %v669_v4   ;;  %767 = vperm.xlu0 %1081, %v729_v3  }
 0x1ce   :  { %v630_v9 = vsub.f32 1.5, %v629_v6 }
 0x1cf   :  { %v1094_v10 = vpop.eup %1093  ;;  %v584_v11 = vadd.f32 1e-05, %v568_v8 }
 0x1d0   :  { %v637_v12 = vmul.f32 %v1094_v10, %v583_v62  ;;  %v631_v14 = vmul.f32 %v1092_v60, %v630_v9  ;;  %vm643_vm0 = vweird.f32 %v1094_v10 }
 0x1d1   :  { %1095 = vrsqrt.f32 %v584_v11  ;;  %vm644_vm2 = vmor %vm642_vm1, %vm643_vm0  ;;  %vm652_vm4 = vweird.f32 %v584_v11 }
 0x1d2   :  { %v638_v15 = vmul.f32 %v1094_v10, %v637_v12  ;;  %v635_v16 = vsel %vm634_vm15, %v1092_v60, %v631_v14 }
 0x1d3   :  { %v670_v17 = vmul.f32 %v635_v16, %v574_v13 }
 0x1d4   :  { %v639_v18 = vmul.f32 0.5, %v638_v15  ;;  %v561_v19 = vpop.xlane.xlu0 %560  ;;  %v743_v54 = vpop.permute.xlu2 %742 }
 0x1d5   :  { %v569_v20 = vmul.f32 0.03125, %v561_v19  ;;  %696 = vperm.xlu1 %1080, %v670_v17  }
 0x1d6   :  { %v640_v21 = vsub.f32 1.5, %v639_v18 }
 0x1d7   :  { %v1096_v22 = vpop.eup %1095  ;;  %v585_v23 = vadd.f32 1e-05, %v569_v20 }
 0x1d8   :  { %v647_v24 = vmul.f32 %v1096_v22, %v584_v11  ;;  %v641_v29 = vmul.f32 %v1094_v10, %v640_v21  ;;  %vm653_vm3 = vweird.f32 %v1096_v22 }
 0x1d9   :  { %1097 = vrsqrt.f32 %v585_v23  ;;  %vm654_vm5 = vmor %vm652_vm4, %vm653_vm3  ;;  %vm662_vm7 = vweird.f32 %v585_v23 }
 0x1da   :  { %v648_v30 = vmul.f32 %v1096_v22, %v647_v24  ;;  %v645_v31 = vsel %vm644_vm2, %v1094_v10, %v641_v29 }
 0x1db   :  { %v671_v33 = vmul.f32 %v645_v31, %v575_v26 }
 0x1dc   :  { %v649_v34 = vmul.f32 0.5, %v648_v30  ;;  %v748_v55 = vpop.permute.xlu1 %747 }
 0x1dd   :  { %701 = vperm.xlu2 %1082, %v671_v33  }
 0x1de   :  { %v650_v35 = vsub.f32 1.5, %v649_v34 }
 0x1df   :  { %v1098_v28 = vpop.eup %1097 }
 0x1e0   :  { %v657_v38 = vmul.f32 %v1098_v28, %v585_v23  ;;  %v651_v40 = vmul.f32 %v1096_v22, %v650_v35  ;;  %vm663_vm6 = vweird.f32 %v1098_v28 }
 0x1e1   :  { %vm664_vm8 = vmor %vm662_vm7, %vm663_vm6 }
 0x1e2   :  { %v658_v36 = vmul.f32 %v1098_v28, %v657_v38  ;;  %v655_v42 = vsel %vm654_vm5, %v1096_v22, %v651_v40 }
 0x1e3   :  { %v672_v43 = vmul.f32 %v655_v42, %v576_v39 }
 0x1e4   :  { %v659_v45 = vmul.f32 0.5, %v658_v36 }
 0x1e5   :  { %706 = vperm.xlu1 %1080, %v672_v43  }
 0x1e6   :  { %v660_v44 = vsub.f32 1.5, %v659_v45 }
 0x1e7   :  { %v738_v59 = vpop.permute.xlu0 %737 }
 0x1e8   :  { %v661_v48 = vmul.f32 %v1098_v28, %v660_v44 }
 0x1ea   :  { %v665_v50 = vsel %vm664_vm8, %v1098_v28, %v661_v48 }
 0x1eb   :  { %v673_v52 = vmul.f32 %v665_v50, %v577_v47 }
 0x1ed   :  { %762 = vperm.xlu1 %1080, %v728_v49   ;;  %711 = vperm.xlu2 %1082, %v673_v52  }
 0x1ef   :  { %v753_v2 = vpop.permute.xlu0 %752 }
 0x1f5   :  { %757 = vperm.xlu2 %1082, %v727_v53  }
 0x217   :  { %v682_v57 = vpop.permute.xlu2 %681 }
 0x218   :  { %v715_v58 = vmul.f32 %v682_v57, %v1351_v32 }
 0x21a   :  { %v771_v60 = vadd.f32 %v738_v59, %v715_v58 }
 0x21c   :  { %v779_v0 = vmul.f32 0.2, %v771_v60 }
 0x21e   :  { %v787_v3 = vmax.f32 %v771_v60, %v779_v0 }
 0x227   :  { %v677_v62 = vpop.permute.xlu1 %676  ;;  %v692_v6 = vpop.permute.xlu2 %691 }
 0x228   :  { %v714_v63 = vmul.f32 %v677_v62, %v1345_v25  ;;  %v717_v32 = vmul.f32 %v692_v6, %v1363_v41 }
 0x22a   :  { %v770_v1 = vadd.f32 %v1399_v5, %v714_v63  ;;  %v773_v8 = vadd.f32 %v748_v55, %v717_v32 }
 0x22c   :  { %v778_v27 = vmul.f32 0.2, %v770_v1  ;;  %v781_v25 = vmul.f32 0.2, %v773_v8 }
 0x22e   :  { %v786_v4 = vmax.f32 %v770_v1, %v778_v27  ;;  %v789_v5 = vmax.f32 %v773_v8, %v781_v25 }
 0x230   :  { %v1058_v7 = vpack.c.bf16 %v787_v3, %v786_v4 }
 0x232   :  { %1059 = vst [vmem:[%s1459_s4] sm:$0xff] %v1058_v7  }
 0x237   :  { %v687_v9 = vpop.permute.xlu0 %686  ;;  %v702_v14 = vpop.permute.xlu2 %701 }
 0x238   :  { %v716_v10 = vmul.f32 %v687_v9, %v1357_v37  ;;  %v719_v19 = vmul.f32 %v702_v14, %v1373_v51 }
 0x23a   :  { %v772_v11 = vadd.f32 %v743_v54, %v716_v10 }
 0x23c   :  { %v780_v12 = vmul.f32 0.2, %v772_v11 }
 0x23e   :  { %v788_v13 = vmax.f32 %v772_v11, %v780_v12 }
 0x23f   :  { %v768_v31 = vpop.permute.xlu0 %767 }
 0x240   :  { %v1063_v15 = vpack.c.bf16 %v789_v5, %v788_v13 }
 0x242   :  { %1075 = vst [vmem:[%s1459_s4 + $0x8] sm:$0xff] %v1063_v15  }
 0x247   :  { %v697_v16 = vpop.permute.xlu1 %696  ;;  %v712_v17 = vpop.permute.xlu2 %711 }
 0x248   :  { %v718_v18 = vmul.f32 %v697_v16, %v1368_v46  ;;  %v721_v30 = vmul.f32 %v712_v17, %v1383_v61 }
 0x24a   :  { %v774_v41 = vadd.f32 %v753_v2, %v718_v18  ;;  %v777_v33 = vadd.f32 %v768_v31, %v721_v30 }
 0x24c   :  { %v782_v37 = vmul.f32 0.2, %v774_v41  ;;  %v785_v51 = vmul.f32 0.2, %v777_v33 }
 0x24e   :  { %v790_v23 = vmax.f32 %v774_v41, %v782_v37  ;;  %v793_v38 = vmax.f32 %v777_v33, %v785_v51 }
 0x24f   :  { %v758_v20 = vpop.permute.xlu2 %757 }
 0x250   :  { %v775_v21 = vadd.f32 %v758_v20, %v719_v19 }
 0x252   :  { %v783_v22 = vmul.f32 0.2, %v775_v21 }
 0x254   :  { %v791_v24 = vmax.f32 %v775_v21, %v783_v22 }
 0x256   :  { %v1068_v26 = vpack.c.bf16 %v791_v24, %v790_v23 }
 0x257   :  { %v707_v29 = vpop.permute.xlu1 %706 }
 0x258   :  { %1076 = vst [vmem:[%s1459_s4 + $0x10] sm:$0xff] %v1068_v26   ;;  %v720_v46 = vmul.f32 %v707_v29, %v1378_v56 }
 0x25f   :  { %v763_v34 = vpop.permute.xlu1 %762 }
 0x260   :  { %v776_v35 = vadd.f32 %v763_v34, %v720_v46 }
 0x262   :  { %v784_v28 = vmul.f32 0.2, %v776_v35 }
 0x264   :  { %v792_v39 = vmax.f32 %v776_v35, %v784_v28 }
 0x266   :  { %v1073_v40 = vpack.c.bf16 %v793_v38, %v792_v39 }
 0x268   :  { %1077 = vst [vmem:[%s1459_s4 + $0x18] sm:$0xff] %v1073_v40  }

// kernel: netd_forward.9
= control target key start
LH: loop header
LB: loop body
LE: loop exit
PB: predicated region body
PF: predicated region fallthrough
CT: control target
= control target key end

     0   :  { %s1229_s1 = inlined_call_operand.vmem [shape: bf16[1024,128], index: 1, kind: input, shape index: {}]   ;;  %s1230_s0 = inlined_call_operand.vmem [shape: bf16[8,1024], index: 0, kind: input, shape index: {}]   ;;  %s1231_s2 = inlined_call_operand.vmem [shape: f32[8,128], index: 2, kind: output, shape index: {}]  }
   0x1   :  { %v946_v0 = vld [vmem:[%s1229_s1 + $0x38] sm:$0xff]  ;;  %v945_v4 = vld [vmem:[%s1229_s1 + $0x30] sm:$0xff]  ;;  %v944_v8 = vld [vmem:[%s1229_s1 + $0x28] sm:$0xff] }
   0x2   :  { %v954_v1 = vld [vmem:[%s1229_s1 + $0x78] sm:$0xff]  ;;  %555 = vmatpush.bf16.msra.mxu0 %v946_v0  ;;  %v953_v5 = vld [vmem:[%s1229_s1 + $0x70] sm:$0xff]  ;;  %v952_v9 = vld [vmem:[%s1229_s1 + $0x68] sm:$0xff] }
   0x3   :  { %v962_v2 = vld [vmem:[%s1229_s1 + $0xb8] sm:$0xff]  ;;  %568 = vmatpush.bf16.msra.mxu1 %v954_v1  ;;  %v961_v6 = vld [vmem:[%s1229_s1 + $0xb0] sm:$0xff]  ;;  %v960_v10 = vld [vmem:[%s1229_s1 + $0xa8] sm:$0xff] }
   0x4   :  { %v970_v3 = vld [vmem:[%s1229_s1 + $0xf8] sm:$0xff]  ;;  %581 = vmatpush.bf16.msra.mxu2 %v962_v2  ;;  %v969_v7 = vld [vmem:[%s1229_s1 + $0xf0] sm:$0xff]  ;;  %v968_v11 = vld [vmem:[%s1229_s1 + $0xe8] sm:$0xff] }
   0x5   :  { %594 = vmatpush.bf16.msra.mxu3 %v970_v3  ;;  %v943_v12 = vld [vmem:[%s1229_s1 + $0x20] sm:$0xff]  ;;  %v942_v16 = vld [vmem:[%s1229_s1 + $0x18] sm:$0xff]  ;;  %v941_v20 = vld [vmem:[%s1229_s1 + $0x10] sm:$0xff] }
   0x6   :  { %556 = vmatpush.bf16.msra.mxu0 %v945_v4  ;;  %v951_v13 = vld [vmem:[%s1229_s1 + $0x60] sm:$0xff]  ;;  %v950_v17 = vld [vmem:[%s1229_s1 + $0x58] sm:$0xff]  ;;  %v949_v21 = vld [vmem:[%s1229_s1 + $0x50] sm:$0xff] }
   0x7   :  { %569 = vmatpush.bf16.msra.mxu1 %v953_v5  ;;  %v959_v14 = vld [vmem:[%s1229_s1 + $0xa0] sm:$0xff]  ;;  %v958_v18 = vld [vmem:[%s1229_s1 + $0x98] sm:$0xff]  ;;  %v957_v22 = vld [vmem:[%s1229_s1 + $0x90] sm:$0xff] }
   0x8   :  { %582 = vmatpush.bf16.msra.mxu2 %v961_v6  ;;  %v967_v15 = vld [vmem:[%s1229_s1 + $0xe0] sm:$0xff]  ;;  %v966_v19 = vld [vmem:[%s1229_s1 + $0xd8] sm:$0xff]  ;;  %v965_v23 = vld [vmem:[%s1229_s1 + $0xd0] sm:$0xff] }
   0x9   :  { %595 = vmatpush.bf16.msra.mxu3 %v969_v7  ;;  %v940_v24 = vld [vmem:[%s1229_s1 + $0x8] sm:$0xff]  ;;  %v11_v29 = vld [vmem:[%s1230_s0] sm:$0xff]  ;;  %v978_v38 = vld [vmem:[%s1229_s1 + $0x138] sm:$0xff] }
   0xa   :  { %557 = vmatpush.bf16.msra.mxu0 %v944_v8  ;;  %v948_v25 = vld [vmem:[%s1229_s1 + $0x48] sm:$0xff]  ;;  %v939_v30 = vld [vmem:[%s1229_s1] sm:$0xff]  ;;  %v147_v33 = vunpack.c.l.b16 %v11_v29  ;;  %v148_v37 = vunpack.c.h.b16 %v11_v29  ;;  %v986_v39 = vld [vmem:[%s1229_s1 + $0x178] sm:$0xff] }
   0xb   :  { %570 = vmatpush.bf16.msra.mxu1 %v952_v9  ;;  %v956_v26 = vld [vmem:[%s1229_s1 + $0x88] sm:$0xff]  ;;  %v947_v31 = vld [vmem:[%s1229_s1 + $0x40] sm:$0xff]  ;;  %v994_v40 = vld [vmem:[%s1229_s1 + $0x1b8] sm:$0xff] }
   0xc   :  { %583 = vmatpush.bf16.msra.mxu2 %v960_v10  ;;  %v964_v27 = vld [vmem:[%s1229_s1 + $0xc8] sm:$0xff]  ;;  %v955_v34 = vld [vmem:[%s1229_s1 + $0x80] sm:$0xff]  ;;  %v1002_v41 = vld [vmem:[%s1229_s1 + $0x1f8] sm:$0xff]  ;;  %v155_v43 = vpack.c.b16 %v147_v33, %v147_v33  ;;  %v156_v45 = vpack.c.b16 %v148_v37, %v148_v37 }
   0xd   :  { %596 = vmatpush.bf16.msra.mxu3 %v968_v11  ;;  %v12_v28 = vld [vmem:[%s1230_s0 + $0x8] sm:$0xff]  ;;  %v963_v35 = vld [vmem:[%s1229_s1 + $0xc0] sm:$0xff]  ;;  %v977_v46 = vld [vmem:[%s1229_s1 + $0x130] sm:$0xff] }
   0xe   :  { %558 = vmatpush.bf16.msra.mxu0 %v943_v12  ;;  %v149_v32 = vunpack.c.l.b16 %v12_v28  ;;  %v150_v36 = vunpack.c.h.b16 %v12_v28  ;;  %v985_v47 = vld [vmem:[%s1229_s1 + $0x170] sm:$0xff]  ;;  %v976_v50 = vld [vmem:[%s1229_s1 + $0x128] sm:$0xff]  ;;  %v975_v54 = vld [vmem:[%s1229_s1 + $0x120] sm:$0xff] }
   0xf   :  { %571 = vmatpush.bf16.msra.mxu1 %v951_v13  ;;  %v993_v48 = vld [vmem:[%s1229_s1 + $0x1b0] sm:$0xff]  ;;  %v984_v51 = vld [vmem:[%s1229_s1 + $0x168] sm:$0xff]  ;;  %v983_v55 = vld [vmem:[%s1229_s1 + $0x160] sm:$0xff] }
  0x10   :  { %584 = vmatpush.bf16.msra.mxu2 %v959_v14  ;;  %v157_v42 = vpack.c.b16 %v149_v32, %v149_v32  ;;  %v158_v44 = vpack.c.b16 %v150_v36, %v150_v36  ;;  %v1001_v49 = vld [vmem:[%s1229_s1 + $0x1f0] sm:$0xff]  ;;  %v992_v52 = vld [vmem:[%s1229_s1 + $0x1a8] sm:$0xff]  ;;  %v991_v56 = vld [vmem:[%s1229_s1 + $0x1a0] sm:$0xff] }
  0x11   :  { %597 = vmatpush.bf16.msra.mxu3 %v967_v15  ;;  %v1000_v53 = vld [vmem:[%s1229_s1 + $0x1e8] sm:$0xff]  ;;  %v999_v57 = vld [vmem:[%s1229_s1 + $0x1e0] sm:$0xff]  ;;  %v974_v58 = vld [vmem:[%s1229_s1 + $0x118] sm:$0xff] }
  0x12   :  { %559 = vmatpush.bf16.msra.mxu0 %v942_v16  ;;  %v982_v59 = vld [vmem:[%s1229_s1 + $0x158] sm:$0xff]  ;;  %v973_v62 = vld [vmem:[%s1229_s1 + $0x110] sm:$0xff]  ;;  %v972_v2 = vld [vmem:[%s1229_s1 + $0x108] sm:$0xff] }
  0x13   :  { %572 = vmatpush.bf16.msra.mxu1 %v950_v17  ;;  %v990_v60 = vld [vmem:[%s1229_s1 + $0x198] sm:$0xff]  ;;  %v981_v63 = vld [vmem:[%s1229_s1 + $0x150] sm:$0xff]  ;;  %v980_v3 = vld [vmem:[%s1229_s1 + $0x148] sm:$0xff] }
  0x14   :  { %585 = vmatpush.bf16.msra.mxu2 %v958_v18  ;;  %v998_v61 = vld [vmem:[%s1229_s1 + $0x1d8] sm:$0xff]  ;;  %v989_v0 = vld [vmem:[%s1229_s1 + $0x190] sm:$0xff]  ;;  %v988_v5 = vld [vmem:[%s1229_s1 + $0x188] sm:$0xff] }
  0x15   :  { %598 = vmatpush.bf16.msra.mxu3 %v966_v19  ;;  %v997_v1 = vld [vmem:[%s1229_s1 + $0x1d0] sm:$0xff]  ;;  %v996_v6 = vld [vmem:[%s1229_s1 + $0x1c8] sm:$0xff]  ;;  %v14_v7 = vld [vmem:[%s1230_s0 + $0x18] sm:$0xff] }
  0x16   :  { %560 = vmatpush.bf16.msra.mxu0 %v941_v20  ;;  %v13_v4 = vld [vmem:[%s1230_s0 + $0x10] sm:$0xff]  ;;  %v971_v10 = vld [vmem:[%s1229_s1 + $0x100] sm:$0xff]  ;;  %v153_v12 = vunpack.c.l.b16 %v14_v7  ;;  %v154_v13 = vunpack.c.h.b16 %v14_v7 }
  0x17   :  { %573 = vmatpush.bf16.msra.mxu1 %v949_v21  ;;  %v151_v8 = vunpack.c.l.b16 %v13_v4  ;;  %v152_v9 = vunpack.c.h.b16 %v13_v4  ;;  %v979_v11 = vld [vmem:[%s1229_s1 + $0x140] sm:$0xff] }
  0x18   :  { %586 = vmatpush.bf16.msra.mxu2 %v957_v22  ;;  %v987_v14 = vld [vmem:[%s1229_s1 + $0x180] sm:$0xff]  ;;  %v161_v18 = vpack.c.b16 %v153_v12, %v153_v12  ;;  %v162_v19 = vpack.c.b16 %v154_v13, %v154_v13 }
  0x19   :  { %599 = vmatpush.bf16.msra.mxu3 %v965_v23  ;;  %v995_v15 = vld [vmem:[%s1229_s1 + $0x1c0] sm:$0xff]  ;;  %v159_v16 = vpack.c.b16 %v151_v8, %v151_v8  ;;  %v160_v17 = vpack.c.b16 %v152_v9, %v152_v9 }
  0x1a   :  { %561 = vmatpush.bf16.msra.mxu0 %v940_v24 }
  0x1b   :  { %574 = vmatpush.bf16.msra.mxu1 %v948_v25 }
  0x1c   :  { %587 = vmatpush.bf16.msra.mxu2 %v956_v26 }
  0x1d   :  { %600 = vmatpush.bf16.msra.mxu3 %v964_v27 }
  0x1e   :  { %562 = vmatpush.bf16.msra.mxu0 %v939_v30 }
  0x1f   :  { %575 = vmatpush.bf16.msra.mxu1 %v947_v31 }
  0x20   :  { %588 = vmatpush.bf16.msra.mxu2 %v955_v34 }
  0x21   :  { %601 = vmatpush.bf16.msra.mxu3 %v963_v35  ;;  %563 = vmatmul.bf16.vlgmr.msra.gmra.mxu0 %v155_v43 }
  0x22   :  { %607 = vmatpush.bf16.msrb.mxu0 %v978_v38  ;;  %576 = vmatmul.bf16.vlgmr.msra.gmra.mxu1 %v156_v45 }
  0x23   :  { %620 = vmatpush.bf16.msrb.mxu1 %v986_v39  ;;  %589 = vmatmul.bf16.vlgmr.msra.gmra.mxu2 %v157_v42 }
  0x24   :  { %633 = vmatpush.bf16.msrb.mxu2 %v994_v40  ;;  %602 = vmatmul.bf16.vlgmr.msra.gmra.mxu3 %v158_v44 }
  0x25   :  { %646 = vmatpush.bf16.msrb.mxu3 %v1002_v41 }
  0x26   :  { %608 = vmatpush.bf16.msrb.mxu0 %v977_v46 }
  0x27   :  { %621 = vmatpush.bf16.msrb.mxu1 %v985_v47 }
  0x28   :  { %634 = vmatpush.bf16.msrb.mxu2 %v993_v48 }
  0x29   :  { %647 = vmatpush.bf16.msrb.mxu3 %v1001_v49 }
  0x2a   :  { %609 = vmatpush.bf16.msrb.mxu0 %v976_v50 }
  0x2b   :  { %622 = vmatpush.bf16.msrb.mxu1 %v984_v51 }
  0x2c   :  { %635 = vmatpush.bf16.msrb.mxu2 %v992_v52 }
  0x2d   :  { %648 = vmatpush.bf16.msrb.mxu3 %v1000_v53 }
  0x2e   :  { %610 = vmatpush.bf16.msrb.mxu0 %v975_v54 }
  0x2f   :  { %623 = vmatpush.bf16.msrb.mxu1 %v983_v55 }
  0x30   :  { %636 = vmatpush.bf16.msrb.mxu2 %v991_v56 }
  0x31   :  { %649 = vmatpush.bf16.msrb.mxu3 %v999_v57 }
  0x32   :  { %611 = vmatpush.bf16.msrb.mxu0 %v974_v58 }
  0x33   :  { %624 = vmatpush.bf16.msrb.mxu1 %v982_v59 }
  0x34   :  { %637 = vmatpush.bf16.msrb.mxu2 %v990_v60 }
  0x35   :  { %650 = vmatpush.bf16.msrb.mxu3 %v998_v61 }
  0x36   :  { %612 = vmatpush.bf16.msrb.mxu0 %v973_v62 }
  0x37   :  { %625 = vmatpush.bf16.msrb.mxu1 %v981_v63 }
  0x38   :  { %638 = vmatpush.bf16.msrb.mxu2 %v989_v0 }
  0x39   :  { %651 = vmatpush.bf16.msrb.mxu3 %v997_v1 }
  0x3a   :  { %613 = vmatpush.bf16.msrb.mxu0 %v972_v2 }
  0x3b   :  { %626 = vmatpush.bf16.msrb.mxu1 %v980_v3 }
  0x3c   :  { %639 = vmatpush.bf16.msrb.mxu2 %v988_v5 }
  0x3d   :  { %652 = vmatpush.bf16.msrb.mxu3 %v996_v6 }
  0x3e   :  { %614 = vmatpush.bf16.msrb.mxu0 %v971_v10 }
  0x3f   :  { %627 = vmatpush.bf16.msrb.mxu1 %v979_v11 }
  0x40   :  { %640 = vmatpush.bf16.msrb.mxu2 %v987_v14 }
  0x41   :  { %653 = vmatpush.bf16.msrb.mxu3 %v995_v15  ;;  %615 = vmatmul.bf16.vlgmr.msrb.gmra.mxu0 %v159_v16 }
  0x42   :  { %628 = vmatmul.bf16.vlgmr.msrb.gmra.mxu1 %v160_v17 }
  0x43   :  { %641 = vmatmul.bf16.vlgmr.msrb.gmra.mxu2 %v161_v18 }
  0x44   :  { %654 = vmatmul.bf16.vlgmr.msrb.gmra.mxu3 %v162_v19 }
  0x9e   :  { %v564_v20 = vpop.f32.mrf.mxu0 }
  0x9f   :  { %v577_v21 = vpop.f32.mrf.mxu1 }
  0xa0   :  { %v578_v28 = vadd.f32 %v577_v21, %v564_v20 }
  0xa6   :  { %v590_v22 = vpop.f32.mrf.mxu2  ;;  %v566_v24 = vpop.f32.mrf.mxu0 }
  0xa7   :  { %v603_v23 = vpop.f32.mrf.mxu3  ;;  %v579_v25 = vpop.f32.mrf.mxu1  ;;  %v591_v29 = vadd.f32 %v590_v22, %v578_v28 }
  0xa9   :  { %v604_v30 = vadd.f32 %v603_v23, %v591_v29 }
  0xae   :  { %v592_v26 = vpop.f32.mrf.mxu2 }
  0xaf   :  { %v605_v27 = vpop.f32.mrf.mxu3 }
  0xbe   :  { %v616_v31 = vpop.f32.mrf.mxu0 }
  0xbf   :  { %v629_v32 = vpop.f32.mrf.mxu1  ;;  %v617_v33 = vadd.f32 %v616_v31, %v604_v30 }
  0xc1   :  { %v630_v34 = vadd.f32 %v629_v32, %v617_v33 }
  0xc6   :  { %v642_v35 = vpop.f32.mrf.mxu2  ;;  %v618_v38 = vpop.f32.mrf.mxu0 }
  0xc7   :  { %v655_v36 = vpop.f32.mrf.mxu3  ;;  %v643_v37 = vadd.f32 %v642_v35, %v630_v34  ;;  %v631_v39 = vpop.f32.mrf.mxu1 }
  0xc9   :  { %v656_v40 = vadd.f32 %v655_v36, %v643_v37 }
  0xcb   :  { %v659_v41 = vsub.f32 0.0, %v656_v40 }
  0xcd   :  { %v660_v42 = vmul.f32 1.442695, %v659_v41 }
  0xce   :  { %v644_v43 = vpop.f32.mrf.mxu2 }
  0xcf   :  { %v657_v44 = vpop.f32.mrf.mxu3  ;;  %1003 = vpow2.f32 %v660_v42 }
  0xd5   :  { %v1004_v45 = vpop.eup %1003 }
  0xd6   :  { %v662_v46 = vadd.f32 1.0, %v1004_v45 }
  0xd8   :  { %1005 = vrcp.f32 %v662_v46  ;;  %v674_v50 = vand.u32 2147483648, %v662_v46  ;;  %v672_v52 = vand.u32 2147483647, %v662_v46  ;;  %vm668_vm1 = vweird.f32 %v662_v46 }
  0xda   :  { %v675_v54 = vor.u32 1.1754944e-38, %v674_v50  ;;  %vm673_vm3 = vcmp.eq.f32.partialorder %v672_v52, 8.507059e+37 }
  0xde   :  { %v1006_v47 = vpop.eup %1005 }
  0xdf   :  { %v664_v48 = vmul.f32 %v1006_v47, %v662_v46  ;;  %vm669_vm0 = vweird.f32 %v1006_v47 }
  0xe0   :  { %vm670_vm2 = vmor %vm668_vm1, %vm669_vm0 }
  0xe1   :  { %v665_v49 = vsub.f32 1.0, %v664_v48 }
  0xe3   :  { %v666_v51 = vmul.f32 %v1006_v47, %v665_v49 }
  0xe5   :  { %v667_v53 = vadd.f32 %v1006_v47, %v666_v51 }
  0xe7   :  { %v671_v55 = vsel %vm670_vm2, %v1006_v47, %v667_v53 }
  0xe8   :  { %v676_v56 = vsel %vm673_vm3, %v675_v54, %v671_v55 }
  0xe9   :  { %678 = vst [vmem:[%s1231_s2] sm:$0xff] %v676_v56 }

</bundles_post_ra>
